<compile_context>
chip_gen: v7x
topology: tpu7x:2x2x1
jax: 0.10.0
libtpu: 0.0.40
codegen_flags: <defaults>
</compile_context>

<pallas_src>
import functools

import jax
import jax.numpy as jnp
from jax.experimental import pallas as pl
from jax.experimental.pallas import tpu as pltpu


# ----------------------------------------------------------------------------
# Fused kernel: depth x (dilated conv + bias + ReLU + batchnorm), single call.
# ----------------------------------------------------------------------------
def _stack_kernel(x_ref, w_ref, b_ref, g_ref, bt_ref, mask_ref, o_ref,
                  a_ref, col_ref, *, depth, shifts, span_p, halo, count):
    # x_ref   : (C, halo + span_p + halo) zero-haloed flat padded input
    # w_ref   : (depth, C, K*K*C)         lane-dense packed weights
    # b_ref, g_ref, bt_ref : (depth, C, 1)
    # mask_ref: (1, span_p)               1.0 at interior (non-padding) positions
    # o_ref   : (C, span_p)               final layer output on the padded flat grid
    # a_ref   : (C, halo + span_p + halo) VMEM working buffer (layers >= 1)
    # col_ref : (K*K*C, span_p)           im2col slab (all taps stacked on sublanes)
    c = o_ref.shape[0]
    mask = mask_ref[...]                        # (1, span_p)
    inv_count = 1.0 / count

    if depth > 1:
        # Only the halos need zeroing; the interior is overwritten each layer
        # and the tail (span..span_p) of y is already 0 (masked).
        a_ref[:, 0:halo] = jnp.zeros((c, halo), jnp.float32)
        a_ref[:, halo + span_p:halo + span_p + halo] = jnp.zeros((c, halo),
                                                                 jnp.float32)

    y = None
    for l in range(depth):                      # depth is small & static -> unrolled
        src = x_ref if l == 0 else a_ref
        # Build the im2col slab: tap t occupies sublanes [t*C, (t+1)*C).
        for t, sh in enumerate(shifts):
            start = halo + sh                   # static, always >= 0
            col_ref[t * c:(t + 1) * c, :] = src[:, start:start + span_p]
        # One MXU matmul per layer: (C, K*K*C) @ (K*K*C, span_p).
        acc = jnp.dot(w_ref[l], col_ref[...],
                      preferred_element_type=jnp.float32)
        # bias + ReLU; zero padding/tail positions so they never enter BN stats
        z = jnp.maximum(acc + b_ref[l], 0.0) * mask          # (C, span_p)
        # one-pass BatchNorm statistics over the N*H*W interior positions
        ssum = jnp.sum(z, axis=1, keepdims=True)             # (C, 1)
        ssq = jnp.sum(z * z, axis=1, keepdims=True)          # (C, 1)
        mean = ssum * inv_count
        var = jnp.maximum(ssq * inv_count - mean * mean, 0.0)  # biased, clamped
        scale = jax.lax.rsqrt(var + 1e-5) * g_ref[l]         # (C, 1)
        offs = bt_ref[l] - mean * scale                      # (C, 1)
        # y == 0 at padding/tail positions (z==0 there and offs*mask==0 there),
        # which preserves the zero-padding semantics for the next layer.
        y = z * scale + offs * mask
        if l + 1 < depth:
            a_ref[:, halo:halo + span_p] = y
    o_ref[...] = y


# ----------------------------------------------------------------------------
# One-time parameter packing (hoisted out of the per-call forward).
# ----------------------------------------------------------------------------
def pack_single_stack_params(params):
    """params: list of (w[K,K,cin,cout], b[cout], gamma[cout], beta[cout])."""
    k = params[0][0].shape[0]
    cin0 = params[0][0].shape[2]
    cout = params[0][0].shape[-1]
    cpad = ((max(cin0, cout) + 7) // 8) * 8      # sublane-aligned channel count
    f32 = jnp.float32
    w_all, b_all, g_all, bt_all = [], [], [], []
    for (wgt, b, g, bt) in params:
        cin_l = wgt.shape[2]
        w_p = jnp.pad(wgt.astype(f32),
                      ((0, 0), (0, 0), (0, cpad - cin_l), (0, cpad - cout)))
        # (K, K, cin, cout) -> (cout, K*K*cin) lane-dense packed weight
        w_all.append(jnp.transpose(w_p, (3, 0, 1, 2)).reshape(cpad, k * k * cpad))
        b_all.append(jnp.pad(b.astype(f32), (0, cpad - cout)).reshape(cpad, 1))
        g_all.append(jnp.pad(g.astype(f32), (0, cpad - cout)).reshape(cpad, 1))
        bt_all.append(jnp.pad(bt.astype(f32), (0, cpad - cout)).reshape(cpad, 1))
    return (jnp.stack(w_all),       # (depth, cpad, K*K*cpad)
            jnp.stack(b_all),       # (depth, cpad, 1)
            jnp.stack(g_all),
            jnp.stack(bt_all),
            cout)


# ----------------------------------------------------------------------------
# single_stack forward (NCHW in / NCHW out, like the PyTorch module).
# ----------------------------------------------------------------------------
def single_stack_forward(x_nchw, w_packed, b_packed, g_packed, bt_packed,
                         dilation, cout):
    n, cin0, h, w = x_nchw.shape
    depth, cpad, kkc = w_packed.shape
    k = int(round((kkc // cpad) ** 0.5))
    pad = ((k - 1) * dilation + 1) // 2          # == PyTorch padding for odd k
    hp, wp = h + 2 * pad, w + 2 * pad
    span = n * hp * wp                           # flattened padded spatial extent
    span_p = ((span + 127) // 128) * 128         # lane-dense row width
    smax = pad * wp + pad                        # largest |tap shift|
    halo = ((smax + 127) // 128) * 128           # lane-aligned zero halo
    ltot = span_p + 2 * halo
    f32 = jnp.float32

    # Static per-tap lane shifts of the flattened padded grid.
    shifts = tuple((dy * dilation - pad) * wp + (dx * dilation - pad)
                   for dy in range(k) for dx in range(k))

    # Per-call prep: NCHW -> channels-first flat padded + haloed input, and mask.
    xp = jnp.pad(x_nchw.astype(f32),
                 ((0, 0), (0, cpad - cin0), (pad, pad), (pad, pad)))
    xflat = jnp.transpose(xp, (1, 0, 2, 3)).reshape(cpad, span)
    xflat = jnp.pad(xflat, ((0, 0), (halo, halo + span_p - span)))
    mask = jnp.pad(jnp.ones((n, h, w), f32),
                   ((0, 0), (pad, pad), (pad, pad))).reshape(1, span)
    mask = jnp.pad(mask, ((0, 0), (0, span_p - span)))

    vmem = pl.BlockSpec(memory_space=pltpu.MemorySpace.VMEM)
    kernel = functools.partial(
        _stack_kernel, depth=depth, shifts=shifts, span_p=span_p, halo=halo,
        count=float(n * h * w))
    out_flat = pl.pallas_call(
        kernel,
        out_shape=jax.ShapeDtypeStruct((cpad, span_p), f32),
        in_specs=[vmem] * 6,
        out_specs=vmem,
        scratch_shapes=[pltpu.VMEM((cpad, ltot), f32),          # working activation
                        pltpu.VMEM((k * k * cpad, span_p), f32)],  # im2col slab
    )(xflat, w_packed, b_packed, g_packed, bt_packed, mask)

    # Extract interior, drop channel padding, back to NCHW.
    out = out_flat[:, :span].reshape(cpad, n, hp, wp)[:cout, :, pad:pad + h,
                                                      pad:pad + w]
    return jnp.transpose(out, (1, 0, 2, 3))


def init_single_stack_params(key, in_channels, out_channels, depth, k=3):
    params = []
    for ii in range(depth):
        inc = in_channels if ii == 0 else out_channels
        key, kw, kb = jax.random.split(key, 3)
        fan_in = inc * k * k
        w = jax.random.normal(kw, (k, k, inc, out_channels), jnp.float32) / jnp.sqrt(fan_in)
        b = 0.01 * jax.random.normal(kb, (out_channels,), jnp.float32)
        gamma = jnp.ones((out_channels,), jnp.float32)   # PyTorch BN default
        beta = jnp.zeros((out_channels,), jnp.float32)   # PyTorch BN default
        params.append((w, b, gamma, beta))
    return params


# ----------------------------------------------------------------------------
# Pure-JAX reference (correctness check only).
# ----------------------------------------------------------------------------
def _ref_forward(x_nchw, params, dilation):
    x = x_nchw
    for (w, b, g, bt) in params:
        k = w.shape[0]
        pad = ((k - 1) * dilation + 1) // 2
        w_oihw = jnp.transpose(w, (3, 2, 0, 1))
        x = jax.lax.conv_general_dilated(
            x, w_oihw, window_strides=(1, 1),
            padding=[(pad, pad), (pad, pad)],
            rhs_dilation=(dilation, dilation),
            dimension_numbers=("NCHW", "OIHW", "NCHW"))
        x = x + b[None, :, None, None]
        x = jnp.maximum(x, 0.0)
        mean = jnp.mean(x, axis=(0, 2, 3), keepdims=True)
        var = jnp.mean((x - mean) ** 2, axis=(0, 2, 3), keepdims=True)
        x = (x - mean) * jax.lax.rsqrt(var + 1e-5)
        x = x * g[None, :, None, None] + bt[None, :, None, None]
    return x


if __name__ == "__main__":
    # Small config consistent with the module: in=4, out=8, depth=2, dilation=2, k=3.
    N, C_IN, C_OUT, H, W = 2, 4, 8, 16, 16
    DEPTH, DILATION, KSIZE = 2, 2, 3

    key = jax.random.PRNGKey(0)
    key, kx = jax.random.split(key)
    x = jax.random.normal(kx, (N, C_IN, H, W), jnp.float32)  # NCHW, as in PyTorch

    params = init_single_stack_params(key, C_IN, C_OUT, DEPTH, KSIZE)

    # One-time parameter packing (outside the per-call hot path).
    w_p, b_p, g_p, bt_p, cout = pack_single_stack_params(params)

    fwd = jax.jit(single_stack_forward, static_argnums=(5, 6))
    out = jax.block_until_ready(fwd(x, w_p, b_p, g_p, bt_p, DILATION, cout))

    ref = jax.block_until_ready(_ref_forward(x, params, DILATION))
    assert out.shape == (N, C_OUT, H, W)
    assert jnp.allclose(out, ref, rtol=1e-4, atol=1e-4), "mismatch vs reference"

    print("KERNEL_OK")
</pallas_src>

<mosaic_0001>
module attributes {stable_mosaic.version = 11 : i64} {
  func.func @_stack_kernel(%arg0: memref<8x1152xf32, #tpu.memory_space<vmem>>, %arg1: memref<2x8x72xf32, #tpu.memory_space<vmem>>, %arg2: memref<2x8x1xf32, #tpu.memory_space<vmem>>, %arg3: memref<2x8x1xf32, #tpu.memory_space<vmem>>, %arg4: memref<2x8x1xf32, #tpu.memory_space<vmem>>, %arg5: memref<1x896xf32, #tpu.memory_space<vmem>>, %arg6: memref<8x896xf32, #tpu.memory_space<vmem>>, %arg7: memref<8x1152xf32, #tpu.memory_space<vmem>>, %arg8: memref<72x896xf32, #tpu.memory_space<vmem>>) attributes {dimension_semantics = [], scalar_prefetch = 0 : i64, scratch_operands = 2 : i64, tpu.core_type = #tpu.core_type<tc>} {
    %c0 = arith.constant 0 : index
    %c0_0 = arith.constant 0 : index
    %0 = vector.load %arg5[%c0, %c0_0] : memref<1x896xf32, #tpu.memory_space<vmem>>, vector<1x896xf32>
    %cst = arith.constant 0.000000e+00 : f32
    %1 = vector.broadcast %cst : f32 to vector<8x128xf32>
    %c0_1 = arith.constant 0 : index
    %c0_2 = arith.constant 0 : index
    %2 = vector.load %arg7[%c0_1, %c0_2] : memref<8x1152xf32, #tpu.memory_space<vmem>>, vector<8x128xf32>
    tpu.vector_store %arg7[%c0_1, %c0_2], %1 {strides = array<i32>} : memref<8x1152xf32, #tpu.memory_space<vmem>>, vector<8x128xf32>,
    %cst_3 = arith.constant 0.000000e+00 : f32
    %3 = vector.broadcast %cst_3 : f32 to vector<8x128xf32>
    %c0_4 = arith.constant 0 : index
    %c1024 = arith.constant 1024 : index
    %4 = vector.load %arg7[%c0_4, %c1024] : memref<8x1152xf32, #tpu.memory_space<vmem>>, vector<8x128xf32>
    tpu.vector_store %arg7[%c0_4, %c1024], %3 {strides = array<i32>} : memref<8x1152xf32, #tpu.memory_space<vmem>>, vector<8x128xf32>,
    %c0_5 = arith.constant 0 : index
    %c86 = arith.constant 86 : index
    %5 = vector.load %arg0[%c0_5, %c86] : memref<8x1152xf32, #tpu.memory_space<vmem>>, vector<8x896xf32>
    %c0_6 = arith.constant 0 : index
    %c0_7 = arith.constant 0 : index
    %6 = vector.load %arg8[%c0_6, %c0_7] : memref<72x896xf32, #tpu.memory_space<vmem>>, vector<8x896xf32>
    tpu.vector_store %arg8[%c0_6, %c0_7], %5 {strides = array<i32>} : memref<72x896xf32, #tpu.memory_space<vmem>>, vector<8x896xf32>,
    %c0_8 = arith.constant 0 : index
    %c88 = arith.constant 88 : index
    %7 = vector.load %arg0[%c0_8, %c88] : memref<8x1152xf32, #tpu.memory_space<vmem>>, vector<8x896xf32>
    %c8 = arith.constant 8 : index
    %c0_9 = arith.constant 0 : index
    %8 = vector.load %arg8[%c8, %c0_9] : memref<72x896xf32, #tpu.memory_space<vmem>>, vector<8x896xf32>
    tpu.vector_store %arg8[%c8, %c0_9], %7 {strides = array<i32>} : memref<72x896xf32, #tpu.memory_space<vmem>>, vector<8x896xf32>,
    %c0_10 = arith.constant 0 : index
    %c90 = arith.constant 90 : index
    %9 = vector.load %arg0[%c0_10, %c90] : memref<8x1152xf32, #tpu.memory_space<vmem>>, vector<8x896xf32>
    %c16 = arith.constant 16 : index
    %c0_11 = arith.constant 0 : index
    %10 = vector.load %arg8[%c16, %c0_11] : memref<72x896xf32, #tpu.memory_space<vmem>>, vector<8x896xf32>
    tpu.vector_store %arg8[%c16, %c0_11], %9 {strides = array<i32>} : memref<72x896xf32, #tpu.memory_space<vmem>>, vector<8x896xf32>,
    %c0_12 = arith.constant 0 : index
    %c126 = arith.constant 126 : index
    %11 = vector.load %arg0[%c0_12, %c126] : memref<8x1152xf32, #tpu.memory_space<vmem>>, vector<8x896xf32>
    %c24 = arith.constant 24 : index
    %c0_13 = arith.constant 0 : index
    %12 = vector.load %arg8[%c24, %c0_13] : memref<72x896xf32, #tpu.memory_space<vmem>>, vector<8x896xf32>
    tpu.vector_store %arg8[%c24, %c0_13], %11 {strides = array<i32>} : memref<72x896xf32, #tpu.memory_space<vmem>>, vector<8x896xf32>,
    %c0_14 = arith.constant 0 : index
    %c128 = arith.constant 128 : index
    %13 = vector.load %arg0[%c0_14, %c128] : memref<8x1152xf32, #tpu.memory_space<vmem>>, vector<8x896xf32>
    %c32 = arith.constant 32 : index
    %c0_15 = arith.constant 0 : index
    %14 = vector.load %arg8[%c32, %c0_15] : memref<72x896xf32, #tpu.memory_space<vmem>>, vector<8x896xf32>
    tpu.vector_store %arg8[%c32, %c0_15], %13 {strides = array<i32>} : memref<72x896xf32, #tpu.memory_space<vmem>>, vector<8x896xf32>,
    %c0_16 = arith.constant 0 : index
    %c130 = arith.constant 130 : index
    %15 = vector.load %arg0[%c0_16, %c130] : memref<8x1152xf32, #tpu.memory_space<vmem>>, vector<8x896xf32>
    %c40 = arith.constant 40 : index
    %c0_17 = arith.constant 0 : index
    %16 = vector.load %arg8[%c40, %c0_17] : memref<72x896xf32, #tpu.memory_space<vmem>>, vector<8x896xf32>
    tpu.vector_store %arg8[%c40, %c0_17], %15 {strides = array<i32>} : memref<72x896xf32, #tpu.memory_space<vmem>>, vector<8x896xf32>,
    %c0_18 = arith.constant 0 : index
    %c166 = arith.constant 166 : index
    %17 = vector.load %arg0[%c0_18, %c166] : memref<8x1152xf32, #tpu.memory_space<vmem>>, vector<8x896xf32>
    %c48 = arith.constant 48 : index
    %c0_19 = arith.constant 0 : index
    %18 = vector.load %arg8[%c48, %c0_19] : memref<72x896xf32, #tpu.memory_space<vmem>>, vector<8x896xf32>
    tpu.vector_store %arg8[%c48, %c0_19], %17 {strides = array<i32>} : memref<72x896xf32, #tpu.memory_space<vmem>>, vector<8x896xf32>,
    %c0_20 = arith.constant 0 : index
    %c168 = arith.constant 168 : index
    %19 = vector.load %arg0[%c0_20, %c168] : memref<8x1152xf32, #tpu.memory_space<vmem>>, vector<8x896xf32>
    %c56 = arith.constant 56 : index
    %c0_21 = arith.constant 0 : index
    %20 = vector.load %arg8[%c56, %c0_21] : memref<72x896xf32, #tpu.memory_space<vmem>>, vector<8x896xf32>
    tpu.vector_store %arg8[%c56, %c0_21], %19 {strides = array<i32>} : memref<72x896xf32, #tpu.memory_space<vmem>>, vector<8x896xf32>,
    %c0_22 = arith.constant 0 : index
    %c170 = arith.constant 170 : index
    %21 = vector.load %arg0[%c0_22, %c170] : memref<8x1152xf32, #tpu.memory_space<vmem>>, vector<8x896xf32>
    %c64 = arith.constant 64 : index
    %c0_23 = arith.constant 0 : index
    %22 = vector.load %arg8[%c64, %c0_23] : memref<72x896xf32, #tpu.memory_space<vmem>>, vector<8x896xf32>
    tpu.vector_store %arg8[%c64, %c0_23], %21 {strides = array<i32>} : memref<72x896xf32, #tpu.memory_space<vmem>>, vector<8x896xf32>,
    %c0_24 = arith.constant 0 : index
    %c0_25 = arith.constant 0 : index
    %c0_26 = arith.constant 0 : index
    %23 = vector.load %arg1[%c0_24, %c0_25, %c0_26] : memref<2x8x72xf32, #tpu.memory_space<vmem>>, vector<1x8x72xf32>
    %24 = vector.shape_cast %23 : vector<1x8x72xf32> to vector<8x72xf32>
    %c0_27 = arith.constant 0 : index
    %c0_28 = arith.constant 0 : index
    %25 = vector.load %arg8[%c0_27, %c0_28] : memref<72x896xf32, #tpu.memory_space<vmem>>, vector<72x896xf32>
    %cst_29 = arith.constant dense<0.000000e+00> : vector<8x896xf32>
    %26 = tpu.matmul %24, %25, %cst_29 {dimension_numbers = #tpu.dot_dimension_numbers<[1], [0], [0], [1], [0, 0, 1, 1], [], []>} : vector<8x72xf32>, vector<72x896xf32>, vector<8x896xf32> -> vector<8x896xf32>
    %c0_30 = arith.constant 0 : index
    %c0_31 = arith.constant 0 : index
    %c0_32 = arith.constant 0 : index
    %27 = vector.load %arg2[%c0_30, %c0_31, %c0_32] : memref<2x8x1xf32, #tpu.memory_space<vmem>>, vector<1x8x1xf32>
    %28 = vector.shape_cast %27 : vector<1x8x1xf32> to vector<8x1xf32>
    %29 = vector.broadcast %28 : vector<8x1xf32> to vector<8x896xf32>
    %30 = arith.addf %26, %29 : vector<8x896xf32>
    %cst_33 = arith.constant 0.000000e+00 : f32
    %31 = vector.broadcast %cst_33 : f32 to vector<8x896xf32>
    %32 = arith.maximumf %30, %31 : vector<8x896xf32>
    %33 = vector.broadcast %0 : vector<1x896xf32> to vector<8x896xf32>
    %34 = arith.mulf %32, %33 : vector<8x896xf32>
    %cst_34 = arith.constant dense<0.000000e+00> : vector<8xf32>
    %35 = vector.multi_reduction <add>, %34, %cst_34 [1] : vector<8x896xf32> to vector<8xf32>
    %36 = vector.shape_cast %35 : vector<8xf32> to vector<8x1xf32>
    %37 = arith.mulf %34, %34 : vector<8x896xf32>
    %cst_35 = arith.constant dense<0.000000e+00> : vector<8xf32>
    %38 = vector.multi_reduction <add>, %37, %cst_35 [1] : vector<8x896xf32> to vector<8xf32>
    %39 = vector.shape_cast %38 : vector<8xf32> to vector<8x1xf32>
    %cst_36 = arith.constant 0.001953125 : f32
    %40 = vector.broadcast %cst_36 : f32 to vector<8x1xf32>
    %41 = arith.mulf %36, %40 : vector<8x1xf32>
    %cst_37 = arith.constant 0.001953125 : f32
    %42 = vector.broadcast %cst_37 : f32 to vector<8x1xf32>
    %43 = arith.mulf %39, %42 : vector<8x1xf32>
    %44 = arith.mulf %41, %41 : vector<8x1xf32>
    %45 = arith.subf %43, %44 : vector<8x1xf32>
    %cst_38 = arith.constant 0.000000e+00 : f32
    %46 = vector.broadcast %cst_38 : f32 to vector<8x1xf32>
    %47 = arith.maximumf %45, %46 : vector<8x1xf32>
    %cst_39 = arith.constant 9.99999974E-6 : f32
    %48 = vector.broadcast %cst_39 : f32 to vector<8x1xf32>
    %49 = arith.addf %47, %48 : vector<8x1xf32>
    %50 = math.rsqrt %49 : vector<8x1xf32>
    %c0_40 = arith.constant 0 : index
    %c0_41 = arith.constant 0 : index
    %c0_42 = arith.constant 0 : index
    %51 = vector.load %arg3[%c0_40, %c0_41, %c0_42] : memref<2x8x1xf32, #tpu.memory_space<vmem>>, vector<1x8x1xf32>
    %52 = vector.shape_cast %51 : vector<1x8x1xf32> to vector<8x1xf32>
    %53 = arith.mulf %50, %52 : vector<8x1xf32>
    %c0_43 = arith.constant 0 : index
    %c0_44 = arith.constant 0 : index
    %c0_45 = arith.constant 0 : index
    %54 = vector.load %arg4[%c0_43, %c0_44, %c0_45] : memref<2x8x1xf32, #tpu.memory_space<vmem>>, vector<1x8x1xf32>
    %55 = vector.shape_cast %54 : vector<1x8x1xf32> to vector<8x1xf32>
    %56 = arith.mulf %41, %53 : vector<8x1xf32>
    %57 = arith.subf %55, %56 : vector<8x1xf32>
    %58 = vector.broadcast %53 : vector<8x1xf32> to vector<8x896xf32>
    %59 = arith.mulf %34, %58 : vector<8x896xf32>
    %60 = vector.broadcast %57 : vector<8x1xf32> to vector<8x896xf32>
    %61 = vector.broadcast %0 : vector<1x896xf32> to vector<8x896xf32>
    %62 = arith.mulf %60, %61 : vector<8x896xf32>
    %63 = arith.addf %59, %62 : vector<8x896xf32>
    %c0_46 = arith.constant 0 : index
    %c128_47 = arith.constant 128 : index
    %64 = vector.load %arg7[%c0_46, %c128_47] : memref<8x1152xf32, #tpu.memory_space<vmem>>, vector<8x896xf32>
    tpu.vector_store %arg7[%c0_46, %c128_47], %63 {strides = array<i32>} : memref<8x1152xf32, #tpu.memory_space<vmem>>, vector<8x896xf32>,
    %c0_48 = arith.constant 0 : index
    %c86_49 = arith.constant 86 : index
    %65 = vector.load %arg7[%c0_48, %c86_49] : memref<8x1152xf32, #tpu.memory_space<vmem>>, vector<8x896xf32>
    %c0_50 = arith.constant 0 : index
    %c0_51 = arith.constant 0 : index
    %66 = vector.load %arg8[%c0_50, %c0_51] : memref<72x896xf32, #tpu.memory_space<vmem>>, vector<8x896xf32>
    tpu.vector_store %arg8[%c0_50, %c0_51], %65 {strides = array<i32>} : memref<72x896xf32, #tpu.memory_space<vmem>>, vector<8x896xf32>,
    %c0_52 = arith.constant 0 : index
    %c88_53 = arith.constant 88 : index
    %67 = vector.load %arg7[%c0_52, %c88_53] : memref<8x1152xf32, #tpu.memory_space<vmem>>, vector<8x896xf32>
    %c8_54 = arith.constant 8 : index
    %c0_55 = arith.constant 0 : index
    %68 = vector.load %arg8[%c8_54, %c0_55] : memref<72x896xf32, #tpu.memory_space<vmem>>, vector<8x896xf32>
    tpu.vector_store %arg8[%c8_54, %c0_55], %67 {strides = array<i32>} : memref<72x896xf32, #tpu.memory_space<vmem>>, vector<8x896xf32>,
    %c0_56 = arith.constant 0 : index
    %c90_57 = arith.constant 90 : index
    %69 = vector.load %arg7[%c0_56, %c90_57] : memref<8x1152xf32, #tpu.memory_space<vmem>>, vector<8x896xf32>
    %c16_58 = arith.constant 16 : index
    %c0_59 = arith.constant 0 : index
    %70 = vector.load %arg8[%c16_58, %c0_59] : memref<72x896xf32, #tpu.memory_space<vmem>>, vector<8x896xf32>
    tpu.vector_store %arg8[%c16_58, %c0_59], %69 {strides = array<i32>} : memref<72x896xf32, #tpu.memory_space<vmem>>, vector<8x896xf32>,
    %c0_60 = arith.constant 0 : index
    %c126_61 = arith.constant 126 : index
    %71 = vector.load %arg7[%c0_60, %c126_61] : memref<8x1152xf32, #tpu.memory_space<vmem>>, vector<8x896xf32>
    %c24_62 = arith.constant 24 : index
    %c0_63 = arith.constant 0 : index
    %72 = vector.load %arg8[%c24_62, %c0_63] : memref<72x896xf32, #tpu.memory_space<vmem>>, vector<8x896xf32>
    tpu.vector_store %arg8[%c24_62, %c0_63], %71 {strides = array<i32>} : memref<72x896xf32, #tpu.memory_space<vmem>>, vector<8x896xf32>,
    %c0_64 = arith.constant 0 : index
    %c128_65 = arith.constant 128 : index
    %73 = vector.load %arg7[%c0_64, %c128_65] : memref<8x1152xf32, #tpu.memory_space<vmem>>, vector<8x896xf32>
    %c32_66 = arith.constant 32 : index
    %c0_67 = arith.constant 0 : index
    %74 = vector.load %arg8[%c32_66, %c0_67] : memref<72x896xf32, #tpu.memory_space<vmem>>, vector<8x896xf32>
    tpu.vector_store %arg8[%c32_66, %c0_67], %73 {strides = array<i32>} : memref<72x896xf32, #tpu.memory_space<vmem>>, vector<8x896xf32>,
    %c0_68 = arith.constant 0 : index
    %c130_69 = arith.constant 130 : index
    %75 = vector.load %arg7[%c0_68, %c130_69] : memref<8x1152xf32, #tpu.memory_space<vmem>>, vector<8x896xf32>
    %c40_70 = arith.constant 40 : index
    %c0_71 = arith.constant 0 : index
    %76 = vector.load %arg8[%c40_70, %c0_71] : memref<72x896xf32, #tpu.memory_space<vmem>>, vector<8x896xf32>
    tpu.vector_store %arg8[%c40_70, %c0_71], %75 {strides = array<i32>} : memref<72x896xf32, #tpu.memory_space<vmem>>, vector<8x896xf32>,
    %c0_72 = arith.constant 0 : index
    %c166_73 = arith.constant 166 : index
    %77 = vector.load %arg7[%c0_72, %c166_73] : memref<8x1152xf32, #tpu.memory_space<vmem>>, vector<8x896xf32>
    %c48_74 = arith.constant 48 : index
    %c0_75 = arith.constant 0 : index
    %78 = vector.load %arg8[%c48_74, %c0_75] : memref<72x896xf32, #tpu.memory_space<vmem>>, vector<8x896xf32>
    tpu.vector_store %arg8[%c48_74, %c0_75], %77 {strides = array<i32>} : memref<72x896xf32, #tpu.memory_space<vmem>>, vector<8x896xf32>,
    %c0_76 = arith.constant 0 : index
    %c168_77 = arith.constant 168 : index
    %79 = vector.load %arg7[%c0_76, %c168_77] : memref<8x1152xf32, #tpu.memory_space<vmem>>, vector<8x896xf32>
    %c56_78 = arith.constant 56 : index
    %c0_79 = arith.constant 0 : index
    %80 = vector.load %arg8[%c56_78, %c0_79] : memref<72x896xf32, #tpu.memory_space<vmem>>, vector<8x896xf32>
    tpu.vector_store %arg8[%c56_78, %c0_79], %79 {strides = array<i32>} : memref<72x896xf32, #tpu.memory_space<vmem>>, vector<8x896xf32>,
    %c0_80 = arith.constant 0 : index
    %c170_81 = arith.constant 170 : index
    %81 = vector.load %arg7[%c0_80, %c170_81] : memref<8x1152xf32, #tpu.memory_space<vmem>>, vector<8x896xf32>
    %c64_82 = arith.constant 64 : index
    %c0_83 = arith.constant 0 : index
    %82 = vector.load %arg8[%c64_82, %c0_83] : memref<72x896xf32, #tpu.memory_space<vmem>>, vector<8x896xf32>
    tpu.vector_store %arg8[%c64_82, %c0_83], %81 {strides = array<i32>} : memref<72x896xf32, #tpu.memory_space<vmem>>, vector<8x896xf32>,
    %c1 = arith.constant 1 : index
    %c0_84 = arith.constant 0 : index
    %c0_85 = arith.constant 0 : index
    %83 = vector.load %arg1[%c1, %c0_84, %c0_85] : memref<2x8x72xf32, #tpu.memory_space<vmem>>, vector<1x8x72xf32>
    %84 = vector.shape_cast %83 : vector<1x8x72xf32> to vector<8x72xf32>
    %c0_86 = arith.constant 0 : index
    %c0_87 = arith.constant 0 : index
    %85 = vector.load %arg8[%c0_86, %c0_87] : memref<72x896xf32, #tpu.memory_space<vmem>>, vector<72x896xf32>
    %cst_88 = arith.constant dense<0.000000e+00> : vector<8x896xf32>
    %86 = tpu.matmul %84, %85, %cst_88 {dimension_numbers = #tpu.dot_dimension_numbers<[1], [0], [0], [1], [0, 0, 1, 1], [], []>} : vector<8x72xf32>, vector<72x896xf32>, vector<8x896xf32> -> vector<8x896xf32>
    %c1_89 = arith.constant 1 : index
    %c0_90 = arith.constant 0 : index
    %c0_91 = arith.constant 0 : index
    %87 = vector.load %arg2[%c1_89, %c0_90, %c0_91] : memref<2x8x1xf32, #tpu.memory_space<vmem>>, vector<1x8x1xf32>
    %88 = vector.shape_cast %87 : vector<1x8x1xf32> to vector<8x1xf32>
    %89 = vector.broadcast %88 : vector<8x1xf32> to vector<8x896xf32>
    %90 = arith.addf %86, %89 : vector<8x896xf32>
    %cst_92 = arith.constant 0.000000e+00 : f32
    %91 = vector.broadcast %cst_92 : f32 to vector<8x896xf32>
    %92 = arith.maximumf %90, %91 : vector<8x896xf32>
    %93 = vector.broadcast %0 : vector<1x896xf32> to vector<8x896xf32>
    %94 = arith.mulf %92, %93 : vector<8x896xf32>
    %cst_93 = arith.constant dense<0.000000e+00> : vector<8xf32>
    %95 = vector.multi_reduction <add>, %94, %cst_93 [1] : vector<8x896xf32> to vector<8xf32>
    %96 = vector.shape_cast %95 : vector<8xf32> to vector<8x1xf32>
    %97 = arith.mulf %94, %94 : vector<8x896xf32>
    %cst_94 = arith.constant dense<0.000000e+00> : vector<8xf32>
    %98 = vector.multi_reduction <add>, %97, %cst_94 [1] : vector<8x896xf32> to vector<8xf32>
    %99 = vector.shape_cast %98 : vector<8xf32> to vector<8x1xf32>
    %cst_95 = arith.constant 0.001953125 : f32
    %100 = vector.broadcast %cst_95 : f32 to vector<8x1xf32>
    %101 = arith.mulf %96, %100 : vector<8x1xf32>
    %cst_96 = arith.constant 0.001953125 : f32
    %102 = vector.broadcast %cst_96 : f32 to vector<8x1xf32>
    %103 = arith.mulf %99, %102 : vector<8x1xf32>
    %104 = arith.mulf %101, %101 : vector<8x1xf32>
    %105 = arith.subf %103, %104 : vector<8x1xf32>
    %cst_97 = arith.constant 0.000000e+00 : f32
    %106 = vector.broadcast %cst_97 : f32 to vector<8x1xf32>
    %107 = arith.maximumf %105, %106 : vector<8x1xf32>
    %cst_98 = arith.constant 9.99999974E-6 : f32
    %108 = vector.broadcast %cst_98 : f32 to vector<8x1xf32>
    %109 = arith.addf %107, %108 : vector<8x1xf32>
    %110 = math.rsqrt %109 : vector<8x1xf32>
    %c1_99 = arith.constant 1 : index
    %c0_100 = arith.constant 0 : index
    %c0_101 = arith.constant 0 : index
    %111 = vector.load %arg3[%c1_99, %c0_100, %c0_101] : memref<2x8x1xf32, #tpu.memory_space<vmem>>, vector<1x8x1xf32>
    %112 = vector.shape_cast %111 : vector<1x8x1xf32> to vector<8x1xf32>
    %113 = arith.mulf %110, %112 : vector<8x1xf32>
    %c1_102 = arith.constant 1 : index
    %c0_103 = arith.constant 0 : index
    %c0_104 = arith.constant 0 : index
    %114 = vector.load %arg4[%c1_102, %c0_103, %c0_104] : memref<2x8x1xf32, #tpu.memory_space<vmem>>, vector<1x8x1xf32>
    %115 = vector.shape_cast %114 : vector<1x8x1xf32> to vector<8x1xf32>
    %116 = arith.mulf %101, %113 : vector<8x1xf32>
    %117 = arith.subf %115, %116 : vector<8x1xf32>
    %118 = vector.broadcast %113 : vector<8x1xf32> to vector<8x896xf32>
    %119 = arith.mulf %94, %118 : vector<8x896xf32>
    %120 = vector.broadcast %117 : vector<8x1xf32> to vector<8x896xf32>
    %121 = vector.broadcast %0 : vector<1x896xf32> to vector<8x896xf32>
    %122 = arith.mulf %120, %121 : vector<8x896xf32>
    %123 = arith.addf %119, %122 : vector<8x896xf32>
    %c0_105 = arith.constant 0 : index
    %c0_106 = arith.constant 0 : index
    %124 = vector.load %arg6[%c0_105, %c0_106] : memref<8x896xf32, #tpu.memory_space<vmem>>, vector<8x896xf32>
    tpu.vector_store %arg6[%c0_105, %c0_106], %123 {strides = array<i32>} : memref<8x896xf32, #tpu.memory_space<vmem>>, vector<8x896xf32>,
    return
  }
}

</mosaic_0001>

<bundles_post_ra>
// kernel: single_stack_forward.1
= control target key start
LH: loop header
LB: loop body
LE: loop exit
PB: predicated region body
PF: predicated region fallthrough
CT: control target
= control target key end

     0   :  { %s2303_s29 = smov 42   ;;  %s2304_s10 = smov 40   ;;  %v2310_v15 = vmov 0.0   ;;  %v2312_v17 = vmov 0   ;;  %vm58_vm0 = vcmask 343040   ;;  %vm112_vm1 = vcmask 326656   ;;  %s2944_s0 = inlined_call_operand.vmem [shape: f32[8,1152], index: 0, kind: input, shape index: {}]   ;;  %s2945_s2 = inlined_call_operand.vmem [shape: f32[2,8,1], index: 2, kind: input, shape index: {}]   ;;  %s2946_s1 = inlined_call_operand.vmem [shape: f32[2,8,72], index: 1, kind: input, shape index: {}]   ;;  %s2947_s5 = inlined_call_operand.vmem [shape: f32[1,896], index: 5, kind: input, shape index: {}]   ;;  %s2948_s3 = inlined_call_operand.vmem [shape: f32[2,8,1], index: 3, kind: input, shape index: {}]   ;;  %s2949_s4 = inlined_call_operand.vmem [shape: f32[2,8,1], index: 4, kind: input, shape index: {}]   ;;  %s2950_s6 = inlined_call_operand.vmem [shape: f32[8,896], index: 6, kind: output, shape index: {}]  }
   0x1   :  { %v2353_v0 = vld [vmem:[%s2944_s0 + $0x8] sm:$0xff]  ;;  %v2358_v1 = vld [vmem:[%s2944_s0 + $0x10] sm:$0xff]  ;;  %v26_v2 = vld [vmem:[%s2944_s0] sm:$0xff]  ;;  %s2305_s11 = smov 38   ;;  %s2306_s12 = smov 2   ;;  %610 = vmatprep.mubr.f32.mxu0 %v2310_v15  ;;  %681 = vmatprep.mubr.f32.mxu1 %v2310_v15  ;;  %vm166_vm2 = vcmask 310272  }
   0x2   :  { %v2047_v3 = vpack.i.bf16 %v2358_v1, %v2353_v0  ;;  %v2368_v4 = vld [vmem:[%s2944_s0 + $0x18] sm:$0xff]  ;;  %v2376_v6 = vld [vmem:[%s2944_s0 + $0x20] sm:$0xff]  ;;  %v2381_v7 = vld [vmem:[%s2944_s0 + $0x28] sm:$0xff]  ;;  %s2307_s15 = smov 126   ;;  %s2308_s16 = smov 90   ;;  %2172 = vset.pattern.permute.xlu1 %v2312_v17  ;;  %2173 = vset.pattern.permute.xlu0 %v2312_v17  ;;  %vm220_vm3 = vcmask 15360  }
   0x3   :  { %v2057_v5 = vpack.i.bf16 %v2368_v4, %v26_v2  ;;  %v2067_v8 = vpack.i.bf16 %v2381_v7, %v2376_v6  ;;  %v2107_v9 = vpack.i.bf16 %v2368_v4, %v2358_v1  ;;  %v2112_v10 = vpack.i.bf16 %v2376_v6, %v2353_v0  ;;  %v2402_v11 = vld [vmem:[%s2944_s0 + $0x30] sm:$0xff]  ;;  %s2309_s17 = smov 88   ;;  %v2415_v13 = vld [vmem:[%s2944_s0 + $0x38] sm:$0xff]  ;;  %s2311_s20 = smov 86   ;;  %v263_v16 = vld [vmem:[%s2944_s0 + $0x40] sm:$0xff] }
   0x4   :  { %2048 = vrot.lane.b32.xlu0 %v2047_v3, %s2303_s29  ;;  %v2117_v12 = vpack.i.bf16 %v2402_v11, %v2381_v7  ;;  %v2142_v14 = vpack.i.bf16 %v2415_v13, %v2402_v11  ;;  %v536_v18 = vld [vmem:[%s2945_s2] sm:$0xff]  ;;  %vm288_vm4 = vcmask 1031168   ;;  %vm342_vm5 = vcmask 736256  }
   0x5   :  { %2058 = vrot.lane.b32.xlu1 %v2057_v5, %s2303_s29  ;;  %vm396_vm6 = vcmask 719872   ;;  %vm450_vm7 = vcmask 703488   ;;  %vm542_vm8 = vcmask 588800   ;;  %vm2314_vm9 = vmmov 0  }
   0x8   :  { %2053 = vrot.lane.b32.xlu0 %v2047_v3, %s2304_s10 }
   0x9   :  { %2063 = vrot.lane.b32.xlu1 %v2057_v5, %s2304_s10 }
   0xc   :  { %2068 = vrot.lane.b32.xlu0 %v2067_v8, %s2303_s29 }
   0xd   :  { %2073 = vrot.lane.b32.xlu1 %v2067_v8, %s2304_s10 }
  0x10   :  { %2078 = vrot.lane.b32.xlu0 %v2047_v3, %s2305_s11 }
  0x11   :  { %2083 = vrot.lane.b32.xlu1 %v2047_v3, %s2306_s12 }
  0x14   :  { %2088 = vrot.lane.b32.xlu0 %v2057_v5, %s2305_s11 }
  0x15   :  { %2093 = vrot.lane.b32.xlu1 %v2057_v5, %s2306_s12 }
  0x18   :  { %2098 = vrot.lane.b32.xlu0 %v2067_v8, %s2305_s11 }
  0x19   :  { %2103 = vrot.lane.b32.xlu1 %v2067_v8, %s2306_s12 }
  0x1c   :  { %2108 = vrot.lane.b32.xlu0 %v2107_v9, %s2307_s15 }
  0x1d   :  { %2113 = vrot.lane.b32.xlu1 %v2112_v10, %s2307_s15 }
  0x20   :  { %2118 = vrot.lane.b32.xlu0 %v2117_v12, %s2307_s15 }
  0x21   :  { %2123 = vrot.lane.b32.xlu1 %v2107_v9, %s2308_s16 }
  0x24   :  { %2128 = vrot.lane.b32.xlu0 %v2107_v9, %s2309_s17 }
  0x25   :  { %2133 = vrot.lane.b32.xlu1 %v2112_v10, %s2308_s16 }
  0x28   :  { %2138 = vrot.lane.b32.xlu0 %v2112_v10, %s2309_s17 }
  0x29   :  { %334 = vrot.lane.b32.xlu1 %v2381_v7, %s2308_s16 }
  0x2c   :  { %388 = vrot.lane.b32.xlu0 %v2381_v7, %s2309_s17 }
  0x2d   :  { %2143 = vrot.lane.b32.xlu1 %v2142_v14, %s2303_s29 }
  0x30   :  { %2148 = vrot.lane.b32.xlu0 %v2142_v14, %s2304_s10 }
  0x31   :  { %436 = vrot.lane.b32.xlu1 %v2358_v1, %s2311_s20 }
  0x34   :  { %438 = vrot.lane.b32.xlu0 %v2368_v4, %s2311_s20 }
  0x35   :  { %434 = vrot.lane.b32.xlu1 %v2353_v0, %s2311_s20 }
  0x38   :  { %2153 = vrot.lane.b32.xlu0 %v2142_v14, %s2305_s11 }
  0x39   :  { %2158 = vrot.lane.b32.xlu1 %v2142_v14, %s2306_s12 }
  0x3c   :  { %440 = vrot.lane.b32.xlu0 %v2376_v6, %s2311_s20 }
  0x3d   :  { %442 = vrot.lane.b32.xlu1 %v2381_v7, %s2311_s20 }
  0x40   :  { %284 = vrot.lane.b32.xlu0 %v2415_v13, %s2307_s15 }
  0x41   :  { %2163 = vrot.lane.b32.xlu1 %v2142_v14, %s2308_s16 }
  0x44   :  { %2168 = vrot.lane.b32.xlu0 %v2142_v14, %s2309_s17 }
  0x45   :  { %286 = vrot.lane.b32.xlu1 %v263_v16, %s2307_s15 }
  0x48   :  { %340 = vrot.lane.b32.xlu0 %v263_v16, %s2308_s16 }
  0x49   :  { %394 = vrot.lane.b32.xlu1 %v263_v16, %s2309_s17 }
  0x4c   :  { %444 = vrot.lane.b32.xlu0 %v2402_v11, %s2311_s20 }
  0x4d   :  { %446 = vrot.lane.b32.xlu1 %v2415_v13, %s2311_s20 }
  0x50   :  { %448 = vrot.lane.b32.xlu0 %v263_v16, %s2311_s20 }
  0x51   :  { %539 = vperm.xlu1 %2172, %v536_v18  }
  0x76   :  { %v2049_v19 = vpop.permute.xlu0 %2048 }
  0x77   :  { %v2059_v20 = vpop.permute.xlu1 %2058  ;;  %v2051_v21 = vunpack.i.h.bf16 %v2049_v19  ;;  %v2050_v22 = vunpack.i.l.bf16 %v2049_v19 }
  0x78   :  { %v2060_v23 = vunpack.i.l.bf16 %v2059_v20  ;;  %v2061_v36 = vunpack.i.h.bf16 %v2059_v20 }
  0x79   :  { %v60_v30 = vsel %vm58_vm0, %v2050_v22, %v2051_v21 }
  0x7a   :  { %v2054_v24 = vpop.permute.xlu0 %2053  ;;  %v59_v34 = vsel %vm58_vm0, %v2060_v23, %v2050_v22  ;;  %v61_v49 = vsel %vm58_vm0, %v2051_v21, %v2061_v36 }
  0x7b   :  { %v2056_v25 = vunpack.i.h.bf16 %v2054_v24  ;;  %v2055_v26 = vunpack.i.l.bf16 %v2054_v24  ;;  %v2064_v27 = vpop.permute.xlu1 %2063 }
  0x7c   :  { %v2065_v28 = vunpack.i.l.bf16 %v2064_v27  ;;  %v2066_v29 = vunpack.i.h.bf16 %v2064_v27 }
  0x7d   :  { %v114_v31 = vsel %vm112_vm1, %v2055_v26, %v2056_v25 }
  0x7e   :  { %v2460_v32 = vpop.permute.xlu0 %2068  ;;  %v1915_v33 = vpack.c.bf16 %v114_v31, %v60_v30  ;;  %v113_v35 = vsel %vm112_vm1, %v2065_v28, %v2055_v26  ;;  %v115_v42 = vsel %vm112_vm1, %v2056_v25, %v2066_v29 }
  0x7f   :  { %v2070_v37 = vunpack.i.l.bf16 %v2460_v32  ;;  %v2465_v38 = vpop.permute.xlu1 %2073  ;;  %v1917_v39 = vpack.c.bf16 %v113_v35, %v59_v34  ;;  %v1933_v52 = vpack.c.bf16 %v115_v42, %v61_v49 }
  0x80   :  { %v2075_v40 = vunpack.i.l.bf16 %v2465_v38  ;;  %1916 = vmatprep.subr.bf16.mxu0 %v1915_v33 }
  0x81   :  { %1918 = vmatpush1.bf16.msra.mxu0 %v1917_v39  ;;  %v62_v41 = vsel %vm58_vm0, %v2061_v36, %v2070_v37 }
  0x82   :  { %v2079_v43 = vpop.permute.xlu0 %2078  ;;  %v116_v44 = vsel %vm112_vm1, %v2066_v29, %v2075_v40 }
  0x83   :  { %v2081_v45 = vunpack.i.h.bf16 %v2079_v43  ;;  %v2080_v46 = vunpack.i.l.bf16 %v2079_v43  ;;  %v2084_v47 = vpop.permute.xlu1 %2083  ;;  %v1931_v48 = vpack.c.bf16 %v116_v44, %v62_v41 }
  0x84   :  { %v2086_v50 = vunpack.i.h.bf16 %v2084_v47  ;;  %v2085_v51 = vunpack.i.l.bf16 %v2084_v47 }
  0x85   :  { %1932 = vmatprep.subr.bf16.mxu1 %v1931_v48  ;;  %v168_v53 = vsel %vm166_vm2, %v2080_v46, %v2081_v45 }
  0x86   :  { %1934 = vmatpush1.bf16.msra.mxu1 %v1933_v52  ;;  %v2089_v54 = vpop.permute.xlu0 %2088  ;;  %v222_v55 = vsel %vm220_vm3, %v2085_v51, %v2086_v50 }
  0x87   :  { %v2090_v56 = vunpack.i.l.bf16 %v2089_v54  ;;  %v2094_v57 = vpop.permute.xlu1 %2093  ;;  %v1919_v58 = vpack.c.bf16 %v222_v55, %v168_v53  ;;  %v2091_v60 = vunpack.i.h.bf16 %v2089_v54 }
  0x88   :  { %v2095_v59 = vunpack.i.l.bf16 %v2094_v57  ;;  %v2096_v61 = vunpack.i.h.bf16 %v2094_v57 }
  0x89   :  { %1920 = vmatprep.subr.bf16.mxu0 %v1919_v58  ;;  %v167_v62 = vsel %vm166_vm2, %v2090_v56, %v2080_v46  ;;  %v169_v12 = vsel %vm166_vm2, %v2081_v45, %v2091_v60 }
  0x8a   :  { %v2479_v63 = vpop.permute.xlu0 %2098  ;;  %v221_v2 = vsel %vm220_vm3, %v2095_v59, %v2085_v51  ;;  %v223_v14 = vsel %vm220_vm3, %v2086_v50, %v2096_v61 }
  0x8b   :  { %v2100_v3 = vunpack.i.l.bf16 %v2479_v63  ;;  %v2483_v5 = vpop.permute.xlu1 %2103  ;;  %v1921_v8 = vpack.c.bf16 %v221_v2, %v167_v62  ;;  %v1937_v24 = vpack.c.bf16 %v223_v14, %v169_v12  ;;  %v2071_v62 = vunpack.i.h.bf16 %v2460_v32 }
  0x8c   :  { %v2105_v9 = vunpack.i.l.bf16 %v2483_v5  ;;  %v2076_v2 = vunpack.i.h.bf16 %v2465_v38  ;;  %v2101_v38 = vunpack.i.h.bf16 %v2479_v63 }
  0x8d   :  { %1922 = vmatpush1.bf16.msra.mxu0 %v1921_v8  ;;  %v170_v10 = vsel %vm166_vm2, %v2091_v60, %v2100_v3 }
  0x8e   :  { %v2109_v16 = vpop.permute.xlu0 %2108  ;;  %v224_v17 = vsel %vm220_vm3, %v2096_v61, %v2105_v9 }
  0x8f   :  { %v2111_v18 = vunpack.i.h.bf16 %v2109_v16  ;;  %v2110_v19 = vunpack.i.l.bf16 %v2109_v16  ;;  %v2114_v20 = vpop.permute.xlu1 %2113  ;;  %v1935_v21 = vpack.c.bf16 %v224_v17, %v170_v10  ;;  %v63_v17 = vsel %vm58_vm0, %v2070_v37, %v2071_v62 }
  0x90   :  { %v2116_v22 = vunpack.i.h.bf16 %v2114_v20  ;;  %v2115_v23 = vunpack.i.l.bf16 %v2114_v20 }
  0x91   :  { %1936 = vmatprep.subr.bf16.mxu1 %v1935_v21  ;;  %v290_v25 = vsel %vm288_vm4, %v2110_v19, %v2111_v18 }
  0x92   :  { %1938 = vmatpush1.bf16.msra.mxu1 %v1937_v24  ;;  %v2495_v26 = vpop.permute.xlu0 %2118  ;;  %v1923_v27 = vpack.c.bf16 %v290_v25, %v2358_v1  ;;  %v289_v28 = vsel %vm288_vm4, %v2115_v23, %v2110_v19  ;;  %v291_v33 = vsel %vm288_vm4, %v2111_v18, %v2116_v22  ;;  %v117_v18 = vsel %vm112_vm1, %v2075_v40, %v2076_v2  ;;  %v2535_v23 = vld [vmem:[%s2946_s1] sm:$0xff] }
  0x93   :  { %v2120_v29 = vunpack.i.l.bf16 %v2495_v26  ;;  %v2124_v30 = vpop.permute.xlu1 %2123  ;;  %v1925_v31 = vpack.c.bf16 %v289_v28, %v2353_v0  ;;  %v1941_v0 = vpack.c.bf16 %v291_v33, %v2368_v4  ;;  %v1949_v24 = vpack.c.bf16 %v117_v18, %v63_v17 }
  0x94   :  { %1924 = vmatprep.subr.bf16.mxu0 %v1923_v27  ;;  %v2126_v34 = vunpack.i.h.bf16 %v2124_v30  ;;  %v2125_v35 = vunpack.i.l.bf16 %v2124_v30  ;;  %v2106_v40 = vunpack.i.h.bf16 %v2483_v5  ;;  %v171_v33 = vsel %vm166_vm2, %v2100_v3, %v2101_v38 }
  0x95   :  { %1926 = vmatpush1.bf16.msra.mxu0 %v1925_v31  ;;  %v292_v36 = vsel %vm288_vm4, %v2116_v22, %v2120_v29 }
  0x96   :  { %v2129_v39 = vpop.permute.xlu0 %2128  ;;  %v1939_v1 = vpack.c.bf16 %v292_v36, %v2376_v6  ;;  %v344_v45 = vsel %vm342_vm5, %v2125_v35, %v2126_v34 }
  0x97   :  { %v2131_v41 = vunpack.i.h.bf16 %v2129_v39  ;;  %v2130_v42 = vunpack.i.l.bf16 %v2129_v39  ;;  %v2134_v43 = vpop.permute.xlu1 %2133  ;;  %v2121_v39 = vunpack.i.h.bf16 %v2495_v26 }
  0x98   :  { %1940 = vmatprep.subr.bf16.mxu1 %v1939_v1  ;;  %v2135_v44 = vunpack.i.l.bf16 %v2134_v43  ;;  %v2136_v6 = vunpack.i.h.bf16 %v2134_v43 }
  0x99   :  { %1942 = vmatpush1.bf16.msra.mxu1 %v1941_v0  ;;  %v398_v46 = vsel %vm396_vm6, %v2130_v42, %v2131_v41 }
  0x9a   :  { %v2139_v47 = vpop.permute.xlu0 %2138  ;;  %v1927_v48 = vpack.c.bf16 %v398_v46, %v344_v45  ;;  %v343_v52 = vsel %vm342_vm5, %v2135_v44, %v2125_v35  ;;  %v345_v60 = vsel %vm342_vm5, %v2126_v34, %v2136_v6  ;;  %v225_v34 = vsel %vm220_vm3, %v2105_v9, %v2106_v40 }
  0x9b   :  { %v2141_v49 = vunpack.i.h.bf16 %v2139_v47  ;;  %v2140_v50 = vunpack.i.l.bf16 %v2139_v47  ;;  %v2509_v51 = vpop.permute.xlu1 %334  ;;  %v1953_v45 = vpack.c.bf16 %v225_v34, %v171_v33  ;;  %v293_v46 = vsel %vm288_vm4, %v2120_v29, %v2121_v39 }
  0x9c   :  { %1928 = vmatprep.subr.bf16.mxu0 %v1927_v48  ;;  %v346_v56 = vsel %vm342_vm5, %v2136_v6, %v2509_v51 }
  0x9d   :  { %v397_v53 = vsel %vm396_vm6, %v2140_v50, %v2130_v42  ;;  %v399_v55 = vsel %vm396_vm6, %v2131_v41, %v2141_v49 }
  0x9e   :  { %v2513_v4 = vpop.permute.xlu0 %388  ;;  %v1929_v54 = vpack.c.bf16 %v397_v53, %v343_v52  ;;  %v1945_v61 = vpack.c.bf16 %v399_v55, %v345_v60  ;;  %v2313_v53 = vmov 0.0|0.0  }
  0x9f   :  { %v400_v57 = vsel %vm396_vm6, %v2141_v49, %v2513_v4  ;;  %v2144_v58 = vpop.permute.xlu1 %2143 }
  0xa0   :  { %v1943_v59 = vpack.c.bf16 %v400_v57, %v346_v56  ;;  %1930 = vmatpush1.bf16.msra.mxu0 %v1929_v54  ;;  %v2145_v10 = vunpack.i.l.bf16 %v2144_v58  ;;  %v2146_v35 = vunpack.i.h.bf16 %v2144_v58  ;;  %v1957_v54 = vpack.c.bf16 %v293_v46, %v2381_v7 }
  0xa2   :  { %v2149_v8 = vpop.permute.xlu0 %2148  ;;  %1944 = vmatprep.subr.bf16.mxu1 %v1943_v59  ;;  %v64_v22 = vsel %vm58_vm0, %v2071_v62, %v2145_v10  ;;  %v65_v9 = vsel %vm58_vm0, %v2145_v10, %v2146_v35 }
  0xa3   :  { %v2150_v12 = vunpack.i.l.bf16 %v2149_v8  ;;  %v437_v14 = vpop.permute.xlu1 %436  ;;  %1946 = vmatpush1.bf16.msra.mxu1 %v1945_v61  ;;  %v2151_v25 = vunpack.i.h.bf16 %v2149_v8 }
  0xa5   :  { %v118_v16 = vsel %vm112_vm1, %v2076_v2, %v2150_v12  ;;  %v119_v1 = vsel %vm112_vm1, %v2150_v12, %v2151_v25 }
  0xa6   :  { %v439_v19 = vpop.permute.xlu0 %438  ;;  %v1947_v37 = vpack.c.bf16 %v118_v16, %v64_v22  ;;  %v1964_v47 = vpack.c.bf16 %v119_v1, %v65_v9 }
  0xa7   :  { %v435_v20 = vpop.permute.xlu1 %434  ;;  %v452_v21 = vsel %vm450_vm7, %v437_v14, %v439_v19 }
  0xa8   :  { %562 = vmatprep.subr.mxu0 %v452_v21  ;;  %v451_v32 = vsel %vm450_vm7, %v435_v20, %v437_v14 }
  0xa9   :  { %563 = vmatpush1.msra.mxu0 %v451_v32  ;;  %v837_v32 = vlaneseq }
  0xaa   :  { %v2154_v27 = vpop.permute.xlu0 %2153  ;;  %1948 = vmatprep.subr.bf16.mxu0 %v1947_v37  ;;  %1841 = vmatmul.mubr.msk.f32.vlgmr.msra.gmra.mrb[0].mxu0 %vm542_vm8, %v2535_v23 }
  0xab   :  { %v2155_v28 = vunpack.i.l.bf16 %v2154_v27  ;;  %v2159_v30 = vpop.permute.xlu1 %2158  ;;  %1950 = vmatpush1.bf16.msra.mxu0 %v1949_v24  ;;  %752 = vmatprep.mubr.f32.mxu0 %v2310_v15  ;;  %v2156_v43 = vunpack.i.h.bf16 %v2154_v27  ;;  %v23_v27 = vld [vmem:[%s2947_s5] sm:$0xff] }
  0xac   :  { %v2160_v31 = vunpack.i.l.bf16 %v2159_v30  ;;  %v2161_v0 = vunpack.i.h.bf16 %v2159_v30 }
  0xad   :  { %v172_v36 = vsel %vm166_vm2, %v2101_v38, %v2155_v28  ;;  %v173_v49 = vsel %vm166_vm2, %v2155_v28, %v2156_v43  ;;  %v838_v38 = vshrl.u32 %v837_v32, 7 }
  0xae   :  { %v441_v41 = vpop.permute.xlu0 %440  ;;  %v226_v42 = vsel %vm220_vm3, %v2106_v40, %v2160_v31  ;;  %v227_v50 = vsel %vm220_vm3, %v2160_v31, %v2161_v0 }
  0xaf   :  { %v443_v44 = vpop.permute.xlu1 %442  ;;  %v1951_v63 = vpack.c.bf16 %v226_v42, %v172_v36  ;;  %v453_v3 = vsel %vm450_vm7, %v439_v19, %v441_v41  ;;  %v1967_v56 = vpack.c.bf16 %v227_v50, %v173_v49  ;;  %v839_v25 = vsub.s32 0, %v838_v38 }
  0xb0   :  { %v454_v5 = vsel %vm450_vm7, %v441_v41, %v443_v44  ;;  %v843_v31 = vsub.s32 1, %v838_v38  ;;  %v851_v43 = vsub.s32 3, %v838_v38  ;;  %v855_v49 = vsub.s32 4, %v838_v38 }
  0xb1   :  { %633 = vmatprep.subr.mxu1 %v454_v5  ;;  %1952 = vmatprep.subr.bf16.mxu0 %v1951_v63  ;;  %v2595_v35 = vrot.slane %v23_v27, %v839_v25  ;;  %v859_v50 = vsub.s32 5, %v838_v38 }
  0xb2   :  { %634 = vmatpush1.msra.mxu1 %v453_v3  ;;  %1954 = vmatpush1.bf16.msra.mxu0 %v1953_v45  ;;  %v285_v48 = vpop.permute.xlu0 %284  ;;  %v2597_v1 = vrot.slane %v23_v27, %v843_v31  ;;  %v2607_v45 = vrot.slane %v23_v27, %v851_v43 }
  0xb3   :  { %v294_v6 = vsel %vm288_vm4, %v2121_v39, %v285_v48  ;;  %v2164_v52 = vpop.permute.xlu1 %2163  ;;  %1963 = vmatprep.subr.bf16.mxu1 %v2313_v53  ;;  %1842 = vmatmul.mubr.msk.f32.vlgmr.msra.gmra.mrb[0].mxu1 %vm542_vm8, %v2535_v23 }
  0xb4   :  { %v1955_v26 = vpack.c.bf16 %v294_v6, %v2402_v11  ;;  %v2165_v29 = vunpack.i.l.bf16 %v2164_v52  ;;  %1965 = vmatpush3.bf16.msra.mxu1 %v1964_v47  ;;  %1891 = vmatprep.mubr.msk.f32.mxu1 %vm2314_vm9, %v2310_v15  ;;  %v2166_v55 = vunpack.i.h.bf16 %v2164_v52  ;;  %v863_v6 = vsub.s32 6, %v838_v38 }
  0xb5   :  { %1966 = vmatprep.subr.bf16.mxu1 %v2313_v53 }
  0xb6   :  { %v2169_v57 = vpop.permute.xlu0 %2168  ;;  %1956 = vmatprep.subr.bf16.mxu0 %v1955_v26  ;;  %v347_v11 = vsel %vm342_vm5, %v2509_v51, %v2165_v29  ;;  %v348_v2 = vsel %vm342_vm5, %v2165_v29, %v2166_v55 }
  0xb7   :  { %v2171_v58 = vunpack.i.h.bf16 %v2169_v57  ;;  %v2170_v59 = vunpack.i.l.bf16 %v2169_v57  ;;  %v287_v60 = vpop.permute.xlu1 %286  ;;  %1958 = vmatpush1.bf16.msra.mxu0 %v1957_v54  ;;  %v2624_v57 = vrot.slane %v23_v27, %v855_v49 }
  0xb8   :  { %v295_v61 = vsel %vm288_vm4, %v285_v48, %v287_v60  ;;  %1968 = vmatpush3.bf16.msra.mxu1 %v1967_v56  ;;  %v2626_v60 = vrot.slane %v23_v27, %v859_v50 }
  0xb9   :  { %v401_v62 = vsel %vm396_vm6, %v2513_v4, %v2170_v59  ;;  %v1970_v7 = vpack.c.bf16 %v295_v61, %v2415_v13  ;;  %1969 = vmatprep.subr.bf16.mxu1 %v2313_v53  ;;  %v402_v8 = vsel %vm396_vm6, %v2170_v59, %v2171_v58  ;;  %v2628_v61 = vrot.slane %v23_v27, %v863_v6 }
  0xba   :  { %v1961_v10 = vpack.c.bf16 %v401_v62, %v347_v11  ;;  %v341_v12 = vpop.permute.xlu0 %340  ;;  %v1959_v14 = vpack.c.bf16 %v402_v8, %v348_v2 }
  0xbb   :  { %v349_v16 = vsel %vm342_vm5, %v2166_v55, %v341_v12  ;;  %v395_v51 = vpop.permute.xlu1 %394 }
  0xbc   :  { %v403_v17 = vsel %vm396_vm6, %v2171_v58, %v395_v51  ;;  %1971 = vmatpush3.bf16.msra.mxu1 %v1970_v7  ;;  %1960 = vmatprep.subr.bf16.mxu0 %v1959_v14 }
  0xbd   :  { %v1973_v18 = vpack.c.bf16 %v403_v17, %v349_v16  ;;  %1962 = vmatpush1.bf16.msra.mxu0 %v1961_v10  ;;  %1972 = vmatprep.subr.bf16.mxu1 %v2313_v53 }
  0xbe   :  { %v445_v13 = vpop.permute.xlu0 %444 }
  0xbf   :  { %v455_v4 = vsel %vm450_vm7, %v443_v44, %v445_v13  ;;  %v447_v19 = vpop.permute.xlu1 %446 }
  0xc0   :  { %1974 = vmatpush3.bf16.msra.mxu1 %v1973_v18  ;;  %v456_v20 = vsel %vm450_vm7, %v445_v13, %v447_v19 }
  0xc1   :  { %704 = vmatprep.subr.mxu0 %v456_v20  ;;  %1889 = vmatprep.subr.mxu1 %v2310_v15 }
  0xc2   :  { %705 = vmatpush1.msra.mxu0 %v455_v4  ;;  %v449_v21 = vpop.permute.xlu0 %448 }
  0xc3   :  { %v457_v22 = vsel %vm450_vm7, %v447_v19, %v449_v21  ;;  %1843 = vmatmul.mubr.msk.f32.vlgmr.msra.gmra.mrb[2].mxu0 %vm542_vm8, %v2535_v23 }
  0xc4   :  { %1890 = vmatpush3.msra.mxu1 %v457_v22  ;;  %1529 = vmatprep.mubr.f32.mxu0 %v2310_v15 }
  0xc5   :  { %1892 = vmatmul.mubr.msk.f32.vlgmr.msra.gmra.mrb[2].mxu1 %vm542_vm8, %v2535_v23  ;;  %v847_v23 = vsub.s32 2, %v838_v38 }
  0xc6   :  { %1600 = vmatprep.mubr.f32.mxu1 %v2310_v15 }
  0xc7   :  { %v2599_v42 = vrot.slane %v23_v27, %v847_v23  ;;  %v909_v23 = vld [vmem:[%s2948_s3] sm:$0xff] }
  0xd0   :  { %v540_v40 = vpop.permute.xlu1 %539 }
 0x17d   :  { %v612_v37 = vpop.f32.mrb[0].mxu0 }
 0x17e   :  { %v614_v24 = vpop.f32.mrb[1].mxu0  ;;  %v613_v28 = vadd.f32 %v612_v37, %v540_v40 }
 0x17f   :  { %v615_v30 = vadd.f32 %v614_v24, %v540_v40 }
 0x180   :  { %v829_v36 = vmax.f32 %v613_v28, 0.0 }
 0x181   :  { %v830_v39 = vmax.f32 %v615_v30, 0.0 }
 0x182   :  { %v2602_v0 = vmul.f32 %v2595_v35, %v829_v36 }
 0x183   :  { %v2605_v44 = vmul.f32 %v2597_v1, %v830_v39 }
 0x184   :  { %v887_v5 = vmul.f32 %v2602_v0, %v2602_v0 }
 0x185   :  { %v888_v9 = vmul.f32 %v2605_v44, %v2605_v44  ;;  %v879_v48 = vadd.f32 %v2605_v44, %v2602_v0 }
 0x186   :  { %v683_v33 = vpop.f32.mrb[0].mxu1 }
 0x187   :  { %v685_v34 = vpop.f32.mrb[1].mxu1  ;;  %v684_v41 = vadd.f32 %v683_v33, %v540_v40  ;;  %v894_v52 = vadd.f32 %v888_v9, %v887_v5 }
 0x188   :  { %v686_v3 = vadd.f32 %v685_v34, %v540_v40 }
 0x189   :  { %v831_v63 = vmax.f32 %v684_v41, 0.0  ;;  %v911_v41 = vld [vmem:[%s2949_s4] sm:$0xff] }
 0x18a   :  { %v832_v47 = vmax.f32 %v686_v3, 0.0 }
 0x18b   :  { %v2614_v46 = vmul.f32 %v2599_v42, %v831_v63 }
 0x18c   :  { %v2621_v29 = vmul.f32 %v2607_v45, %v832_v47 }
 0x18d   :  { %v889_v26 = vmul.f32 %v2614_v46, %v2614_v46  ;;  %v880_v55 = vadd.f32 %v879_v48, %v2614_v46 }
 0x18e   :  { %v890_v62 = vmul.f32 %v2621_v29, %v2621_v29 }
 0x18f   :  { %v895_v10 = vadd.f32 %v894_v52, %v889_v26  ;;  %v881_v51 = vadd.f32 %v880_v55, %v2621_v29 }
 0x191   :  { %v896_v19 = vadd.f32 %v895_v10, %v890_v62 }
 0x196   :  { %v754_v54 = vpop.f32.mrb[2].mxu0 }
 0x197   :  { %v755_v56 = vadd.f32 %v754_v54, %v540_v40  ;;  %v756_v58 = vpop.f32.mrb[3].mxu0 }
 0x198   :  { %v757_v59 = vadd.f32 %v756_v58, %v540_v40  ;;  %v825_v11 = vpop.f32.mrb[2].mxu1 }
 0x199   :  { %v833_v7 = vmax.f32 %v755_v56, 0.0  ;;  %v826_v2 = vadd.f32 %v825_v11, %v540_v40  ;;  %v1893_v8 = vpop.f32.mrb[3].mxu1 }
 0x19a   :  { %v834_v12 = vmax.f32 %v757_v59, 0.0 }
 0x19b   :  { %v876_v14 = vmul.f32 %v2624_v57, %v833_v7  ;;  %v835_v16 = vmax.f32 %v826_v2, 0.0 }
 0x19c   :  { %v877_v17 = vmul.f32 %v2626_v60, %v834_v12 }
 0x19d   :  { %v2636_v18 = vmul.f32 %v2628_v61, %v835_v16  ;;  %v882_v13 = vadd.f32 %v881_v51, %v876_v14  ;;  %v891_v4 = vmul.f32 %v876_v14, %v876_v14 }
 0x19e   :  { %v892_v20 = vmul.f32 %v877_v17, %v877_v17 }
 0x19f   :  { %v883_v21 = vadd.f32 %v882_v13, %v877_v17  ;;  %v893_v22 = vmul.f32 %v2636_v18, %v2636_v18  ;;  %v897_v32 = vadd.f32 %v896_v19, %v891_v4 }
 0x1a1   :  { %v884_v37 = vadd.f32 %v883_v21, %v2636_v18  ;;  %v898_v24 = vadd.f32 %v897_v32, %v892_v20 }
 0x1a3   :  { %885 = vadd.xlane.f32.xlu0 %v884_v37  ;;  %v899_v38 = vadd.f32 %v898_v24, %v893_v22 }
 0x1a5   :  { %900 = vadd.xlane.f32.xlu1 %v899_v38 }
 0x230   :  { %v886_v40 = vpop.xlane.xlu0 %885 }
 0x231   :  { %v902_v25 = vmul.f32 0.001953125, %v886_v40 }
 0x232   :  { %v901_v27 = vpop.xlane.xlu1 %900 }
 0x233   :  { %v904_v28 = vmul.f32 %v902_v25, %v902_v25  ;;  %v903_v30 = vmul.f32 0.001953125, %v901_v27 }
 0x235   :  { %v905_v31 = vsub.f32 %v903_v30, %v904_v28 }
 0x237   :  { %v906_v33 = vmax.f32 %v905_v31, 0.0 }
 0x239   :  { %v907_v34 = vadd.f32 1e-05, %v906_v33 }
 0x23b   :  { %2299 = vrsqrt.f32 %v907_v34 }
 0x245   :  { %v2300_v36 = vpop.eup %2299 }
 0x246   :  { %v910_v39 = vmul.f32 %v2300_v36, %v909_v23 }
 0x248   :  { %916 = vperm.xlu0 %2173, %v910_v39   ;;  %v912_v43 = vmul.f32 %v910_v39, %v902_v25 }
 0x24a   :  { %v913_v63 = vsub.f32 %v911_v41, %v912_v43 }
 0x24c   :  { %928 = vperm.xlu1 %2172, %v913_v63  }
 0x2c7   :  { %v917_v3 = vpop.permute.xlu0 %916 }
 0x2c8   :  { %v919_v5 = vmul.f32 %v917_v3, %v2602_v0  ;;  %v920_v47 = vmul.f32 %v917_v3, %v2605_v44  ;;  %v921_v6 = vmul.f32 %v917_v3, %v2614_v46  ;;  %v922_v56 = vmul.f32 %v917_v3, %v2621_v29 }
 0x2c9   :  { %v923_v58 = vmul.f32 %v917_v3, %v876_v14  ;;  %v924_v7 = vmul.f32 %v917_v3, %v877_v17  ;;  %v925_v16 = vmul.f32 %v917_v3, %v2636_v18  ;;  %v1846_v18 = vld [vmem:[%s2945_s2 + $0x8] sm:$0xff] }
 0x2cb   :  { %v929_v9 = vpop.permute.xlu1 %928 }
 0x2cc   :  { %v931_v48 = vmul.f32 %v929_v9, %v2595_v35  ;;  %v932_v49 = vmul.f32 %v929_v9, %v2597_v1  ;;  %v933_v50 = vmul.f32 %v929_v9, %v2599_v42  ;;  %v934_v54 = vmul.f32 %v929_v9, %v2607_v45 }
 0x2cd   :  { %v935_v55 = vmul.f32 %v929_v9, %v2624_v57  ;;  %v936_v62 = vmul.f32 %v929_v9, %v2626_v60  ;;  %v937_v12 = vmul.f32 %v929_v9, %v2628_v61 }
 0x2ce   :  { %v2653_v52 = vadd.f32 %v931_v48, %v919_v5  ;;  %v2655_v26 = vadd.f32 %v932_v49, %v920_v47  ;;  %v2659_v0 = vadd.f32 %v933_v50, %v921_v6  ;;  %v2666_v46 = vadd.f32 %v934_v54, %v922_v56 }
 0x2cf   :  { %v2668_v59 = vadd.f32 %v935_v55, %v923_v58  ;;  %v2679_v2 = vadd.f32 %v936_v62, %v924_v7  ;;  %v2697_v51 = vadd.f32 %v937_v12, %v925_v16 }
 0x2d0   :  { %v2204_v44 = vpack.i.bf16 %v2655_v26, %v2653_v52  ;;  %v2214_v11 = vpack.i.bf16 %v2659_v0, %v2310_v15  ;;  %v2234_v8 = vpack.i.bf16 %v2659_v0, %v2655_v26  ;;  %v2264_v14 = vpack.i.bf16 %v2666_v46, %v2653_v52 }
 0x2d1   :  { %v2224_v29 = vpack.i.bf16 %v2668_v59, %v2666_v46  ;;  %v2244_v10 = vpack.i.bf16 %v2679_v2, %v2668_v59  ;;  %v2274_v17 = vpack.i.bf16 %v2697_v51, %v2679_v2 }
 0x2d2   :  { %2205 = vrot.lane.b32.xlu0 %v2204_v44, %s2305_s11  ;;  %2175 = vrot.lane.b32.xlu1 %v2204_v44, %s2303_s29 }
 0x2d6   :  { %2215 = vrot.lane.b32.xlu0 %v2214_v11, %s2305_s11  ;;  %2180 = vrot.lane.b32.xlu1 %v2204_v44, %s2304_s10 }
 0x2da   :  { %2225 = vrot.lane.b32.xlu0 %v2224_v29, %s2305_s11  ;;  %2185 = vrot.lane.b32.xlu1 %v2214_v11, %s2303_s29 }
 0x2de   :  { %2235 = vrot.lane.b32.xlu0 %v2234_v8, %s2307_s15  ;;  %2190 = vrot.lane.b32.xlu1 %v2214_v11, %s2304_s10 }
 0x2e2   :  { %2245 = vrot.lane.b32.xlu0 %v2244_v10, %s2307_s15  ;;  %2195 = vrot.lane.b32.xlu1 %v2224_v29, %s2303_s29 }
 0x2e6   :  { %2255 = vrot.lane.b32.xlu0 %v2234_v8, %s2309_s17  ;;  %2200 = vrot.lane.b32.xlu1 %v2224_v29, %s2304_s10 }
 0x2ea   :  { %2265 = vrot.lane.b32.xlu0 %v2264_v14, %s2309_s17  ;;  %2210 = vrot.lane.b32.xlu1 %v2204_v44, %s2306_s12 }
 0x2ee   :  { %1308 = vrot.lane.b32.xlu0 %v2668_v59, %s2309_s17  ;;  %2220 = vrot.lane.b32.xlu1 %v2214_v11, %s2306_s12 }
 0x2f2   :  { %2275 = vrot.lane.b32.xlu0 %v2274_v17, %s2304_s10  ;;  %2230 = vrot.lane.b32.xlu1 %v2224_v29, %s2306_s12 }
 0x2f6   :  { %1357 = vrot.lane.b32.xlu0 %v2659_v0, %s2311_s20  ;;  %2240 = vrot.lane.b32.xlu1 %v2264_v14, %s2307_s15 }
 0x2fa   :  { %2280 = vrot.lane.b32.xlu0 %v2274_v17, %s2305_s11  ;;  %2250 = vrot.lane.b32.xlu1 %v2234_v8, %s2308_s16 }
 0x2fe   :  { %1359 = vrot.lane.b32.xlu0 %v2666_v46, %s2311_s20  ;;  %2260 = vrot.lane.b32.xlu1 %v2264_v14, %s2308_s16 }
 0x302   :  { %1206 = vrot.lane.b32.xlu0 %v2697_v51, %s2307_s15  ;;  %1255 = vrot.lane.b32.xlu1 %v2668_v59, %s2308_s16 }
 0x306   :  { %2295 = vrot.lane.b32.xlu0 %v2274_v17, %s2309_s17  ;;  %2270 = vrot.lane.b32.xlu1 %v2274_v17, %s2303_s29 }
 0x30a   :  { %1261 = vrot.lane.b32.xlu0 %v2310_v15, %s2308_s16  ;;  %1355 = vrot.lane.b32.xlu1 %v2655_v26, %s2311_s20 }
 0x30e   :  { %1363 = vrot.lane.b32.xlu0 %v2679_v2, %s2311_s20  ;;  %1353 = vrot.lane.b32.xlu1 %v2653_v52, %s2311_s20 }
 0x312   :  { %2285 = vrot.lane.b32.xlu1 %v2274_v17, %s2306_s12  ;;  %1367 = vrot.lane.b32.xlu0 %v2310_v15, %s2311_s20 }
 0x316   :  { %1361 = vrot.lane.b32.xlu1 %v2668_v59, %s2311_s20 }
 0x31a   :  { %1208 = vrot.lane.b32.xlu1 %v2310_v15, %s2307_s15 }
 0x31e   :  { %2290 = vrot.lane.b32.xlu1 %v2274_v17, %s2308_s16 }
 0x322   :  { %1314 = vrot.lane.b32.xlu1 %v2310_v15, %s2309_s17 }
 0x326   :  { %1365 = vrot.lane.b32.xlu1 %v2697_v51, %s2311_s20 }
 0x32a   :  { %1459 = vperm.xlu1 %2172, %v1846_v18  }
 0x344   :  { %v2743_v13 = vpop.permute.xlu0 %2205  ;;  %v2176_v4 = vpop.permute.xlu1 %2175 }
 0x345   :  { %v2178_v19 = vunpack.i.h.bf16 %v2176_v4  ;;  %v2177_v20 = vunpack.i.l.bf16 %v2176_v4  ;;  %v2208_v49 = vunpack.i.h.bf16 %v2743_v13  ;;  %v2207_v50 = vunpack.i.l.bf16 %v2743_v13 }
 0x347   :  { %v985_v24 = vsel %vm58_vm0, %v2177_v20, %v2178_v19  ;;  %v1091_v10 = vsel %vm166_vm2, %v2207_v50, %v2208_v49 }
 0x348   :  { %v2745_v21 = vpop.permute.xlu0 %2215  ;;  %v2181_v22 = vpop.permute.xlu1 %2180 }
 0x349   :  { %v2183_v32 = vunpack.i.h.bf16 %v2181_v22  ;;  %v2182_v37 = vunpack.i.l.bf16 %v2181_v22  ;;  %v2217_v8 = vunpack.i.l.bf16 %v2745_v21 }
 0x34b   :  { %v1038_v38 = vsel %vm112_vm1, %v2182_v37, %v2183_v32 }
 0x34c   :  { %v2749_v40 = vpop.permute.xlu0 %2225  ;;  %v2186_v25 = vpop.permute.xlu1 %2185  ;;  %v1975_v27 = vpack.c.bf16 %v1038_v38, %v985_v24 }
 0x34d   :  { %v2187_v28 = vunpack.i.l.bf16 %v2186_v25  ;;  %v2188_v3 = vunpack.i.h.bf16 %v2186_v25 }
 0x34e   :  { %1976 = vmatprep.subr.bf16.mxu0 %v1975_v27 }
 0x34f   :  { %v984_v34 = vsel %vm58_vm0, %v2187_v28, %v2177_v20  ;;  %v986_v55 = vsel %vm58_vm0, %v2178_v19, %v2188_v3  ;;  %v1090_v19 = vsel %vm166_vm2, %v2217_v8, %v2207_v50  ;;  %v2227_v20 = vunpack.i.l.bf16 %v2749_v40 }
 0x350   :  { %v2751_v30 = vpop.permute.xlu0 %2235  ;;  %v2191_v31 = vpop.permute.xlu1 %2190 }
 0x351   :  { %v2192_v33 = vunpack.i.l.bf16 %v2191_v31  ;;  %v2193_v43 = vunpack.i.h.bf16 %v2191_v31  ;;  %v2238_v29 = vunpack.i.h.bf16 %v2751_v30  ;;  %v2237_v7 = vunpack.i.l.bf16 %v2751_v30 }
 0x353   :  { %v1037_v23 = vsel %vm112_vm1, %v2192_v33, %v2182_v37  ;;  %v1039_v47 = vsel %vm112_vm1, %v2183_v32, %v2193_v43  ;;  %v1211_v4 = vsel %vm288_vm4, %v2237_v7, %v2238_v29  ;;  %v2218_v32 = vunpack.i.h.bf16 %v2745_v21 }
 0x354   :  { %v1977_v36 = vpack.c.bf16 %v1037_v23, %v984_v34  ;;  %v2755_v39 = vpop.permute.xlu0 %2245  ;;  %v2757_v41 = vpop.permute.xlu1 %2195  ;;  %v1993_v58 = vpack.c.bf16 %v1039_v47, %v986_v55  ;;  %v1983_v25 = vpack.c.bf16 %v1211_v4, %v2655_v26 }
 0x355   :  { %v2197_v63 = vunpack.i.l.bf16 %v2757_v41  ;;  %v1093_v30 = vsel %vm166_vm2, %v2218_v32, %v2227_v20  ;;  %v1092_v31 = vsel %vm166_vm2, %v2208_v49, %v2218_v32  ;;  %v2247_v26 = vunpack.i.l.bf16 %v2755_v39 }
 0x356   :  { %1978 = vmatpush1.bf16.msra.mxu0 %v1977_v36 }
 0x357   :  { %v987_v6 = vsel %vm58_vm0, %v2188_v3, %v2197_v63 }
 0x358   :  { %v2760_v5 = vpop.permute.xlu1 %2200  ;;  %v2764_v48 = vpop.permute.xlu0 %2255 }
 0x359   :  { %v2202_v9 = vunpack.i.l.bf16 %v2760_v5  ;;  %v2258_v3 = vunpack.i.h.bf16 %v2764_v48  ;;  %v2257_v47 = vunpack.i.l.bf16 %v2764_v48 }
 0x35b   :  { %v1040_v54 = vsel %vm112_vm1, %v2193_v43, %v2202_v9 }
 0x35c   :  { %v2211_v44 = vpop.permute.xlu1 %2210  ;;  %v1991_v56 = vpack.c.bf16 %v1040_v54, %v987_v6  ;;  %v2780_v14 = vpop.permute.xlu0 %2265 }
 0x35d   :  { %v2213_v11 = vunpack.i.h.bf16 %v2211_v44  ;;  %v2212_v62 = vunpack.i.l.bf16 %v2211_v44 }
 0x35e   :  { %1992 = vmatprep.subr.bf16.mxu1 %v1991_v56 }
 0x35f   :  { %1994 = vmatpush1.bf16.msra.mxu1 %v1993_v58  ;;  %v1144_v12 = vsel %vm220_vm3, %v2212_v62, %v2213_v11 }
 0x360   :  { %v2221_v16 = vpop.permute.xlu1 %2220  ;;  %v1979_v17 = vpack.c.bf16 %v1144_v12, %v1091_v10  ;;  %v2791_v27 = vpop.permute.xlu0 %1308 }
 0x361   :  { %v2222_v18 = vunpack.i.l.bf16 %v2221_v16  ;;  %v2223_v13 = vunpack.i.h.bf16 %v2221_v16 }
 0x362   :  { %1980 = vmatprep.subr.bf16.mxu0 %v1979_v17 }
 0x363   :  { %v1143_v22 = vsel %vm220_vm3, %v2222_v18, %v2212_v62  ;;  %v1145_v28 = vsel %vm220_vm3, %v2213_v11, %v2223_v13  ;;  %v2267_v62 = vunpack.i.l.bf16 %v2780_v14 }
 0x364   :  { %v1981_v37 = vpack.c.bf16 %v1143_v22, %v1090_v19  ;;  %v2787_v24 = vpop.permute.xlu1 %2230  ;;  %v1997_v23 = vpack.c.bf16 %v1145_v28, %v1092_v31  ;;  %v2809_v54 = vpop.permute.xlu0 %2275  ;;  %v2198_v31 = vunpack.i.h.bf16 %v2757_v41  ;;  %v2248_v41 = vunpack.i.h.bf16 %v2755_v39 }
 0x365   :  { %v2232_v38 = vunpack.i.l.bf16 %v2787_v24 }
 0x366   :  { %1982 = vmatpush1.bf16.msra.mxu0 %v1981_v37 }
 0x367   :  { %1984 = vmatprep.subr.bf16.mxu0 %v1983_v25  ;;  %v1146_v21 = vsel %vm220_vm3, %v2223_v13, %v2232_v38 }
 0x368   :  { %v2241_v33 = vpop.permute.xlu1 %2240  ;;  %v1995_v34 = vpack.c.bf16 %v1146_v21, %v1093_v30  ;;  %v1358_v16 = vpop.permute.xlu0 %1357  ;;  %v2203_v21 = vunpack.i.h.bf16 %v2760_v5  ;;  %v2233_v5 = vunpack.i.h.bf16 %v2787_v24 }
 0x369   :  { %v2243_v36 = vunpack.i.h.bf16 %v2241_v33  ;;  %v2242_v43 = vunpack.i.l.bf16 %v2241_v33  ;;  %v2277_v33 = vunpack.i.l.bf16 %v2809_v54 }
 0x36a   :  { %1996 = vmatprep.subr.bf16.mxu1 %v1995_v34 }
 0x36b   :  { %v1212_v50 = vsel %vm288_vm4, %v2238_v29, %v2243_v36  ;;  %v1210_v6 = vsel %vm288_vm4, %v2242_v43, %v2237_v7  ;;  %1998 = vmatpush1.bf16.msra.mxu1 %v1997_v23  ;;  %v1213_v49 = vsel %vm288_vm4, %v2243_v36, %v2247_v26  ;;  %v1317_v7 = vsel %vm396_vm6, %v2257_v47, %v2258_v3 }
 0x36c   :  { %v2001_v55 = vpack.c.bf16 %v1212_v50, %v2659_v0  ;;  %v1985_v44 = vpack.c.bf16 %v1210_v6, %v2653_v52  ;;  %v2251_v56 = vpop.permute.xlu1 %2250  ;;  %v1999_v58 = vpack.c.bf16 %v1213_v49, %v2666_v46  ;;  %v2268_v52 = vunpack.i.h.bf16 %v2780_v14  ;;  %v2828_v25 = vpop.permute.xlu0 %2280 }
 0x36d   :  { %v2253_v11 = vunpack.i.h.bf16 %v2251_v56  ;;  %v2252_v48 = vunpack.i.l.bf16 %v2251_v56  ;;  %v1316_v46 = vsel %vm396_vm6, %v2267_v62, %v2257_v47  ;;  %v2841_v47 = vld [vmem:[%s2946_s1 + $0x8] sm:$0xff]  ;;  %v1042_v6 = vsel %vm112_vm1, %v2203_v21, %v2277_v33 }
 0x36e   :  { %1986 = vmatpush1.bf16.msra.mxu0 %v1985_v44  ;;  %2000 = vmatprep.subr.bf16.mxu1 %v1999_v58  ;;  %v1319_v19 = vsel %vm396_vm6, %v2268_v52, %v2791_v27  ;;  %v1318_v32 = vsel %vm396_vm6, %v2258_v3, %v2268_v52  ;;  %v1041_v3 = vsel %vm112_vm1, %v2202_v9, %v2203_v21  ;;  %v2282_v9 = vunpack.i.l.bf16 %v2828_v25 }
 0x36f   :  { %2002 = vmatpush1.bf16.msra.mxu1 %v2001_v55  ;;  %v1264_v29 = vsel %vm342_vm5, %v2252_v48, %v2253_v11  ;;  %v988_v49 = vsel %vm58_vm0, %v2197_v63, %v2198_v31  ;;  %v2228_v58 = vunpack.i.h.bf16 %v2749_v40 }
 0x370   :  { %v2261_v8 = vpop.permute.xlu1 %2260  ;;  %v1987_v10 = vpack.c.bf16 %v1317_v7, %v1264_v29  ;;  %v1360_v36 = vpop.permute.xlu0 %1359  ;;  %v2009_v56 = vpack.c.bf16 %v1041_v3, %v988_v49  ;;  %v1147_v29 = vsel %vm220_vm3, %v2232_v38, %v2233_v5  ;;  %v2278_v7 = vunpack.i.h.bf16 %v2809_v54 }
 0x371   :  { %v2263_v12 = vunpack.i.h.bf16 %v2261_v8  ;;  %v2262_v0 = vunpack.i.l.bf16 %v2261_v8  ;;  %v1214_v54 = vsel %vm288_vm4, %v2247_v26, %v2248_v41 }
 0x372   :  { %1988 = vmatprep.subr.bf16.mxu0 %v1987_v10  ;;  %v1095_v10 = vsel %vm166_vm2, %v2228_v58, %v2282_v9  ;;  %v1043_v40 = vsel %vm112_vm1, %v2277_v33, %v2278_v7  ;;  %v2017_v39 = vpack.c.bf16 %v1214_v54, %v2668_v59 }
 0x373   :  { %v1263_v17 = vsel %vm342_vm5, %v2262_v0, %v2252_v48  ;;  %v1265_v18 = vsel %vm342_vm5, %v2253_v11, %v2263_v12  ;;  %v1094_v0 = vsel %vm166_vm2, %v2227_v20, %v2228_v58  ;;  %v2283_v20 = vunpack.i.h.bf16 %v2828_v25 }
 0x374   :  { %v1989_v13 = vpack.c.bf16 %v1316_v46, %v1263_v17  ;;  %v2821_v4 = vpop.permute.xlu1 %1255  ;;  %v2005_v37 = vpack.c.bf16 %v1318_v32, %v1265_v18  ;;  %v1207_v11 = vpop.permute.xlu0 %1206  ;;  %v2013_v17 = vpack.c.bf16 %v1147_v29, %v1094_v0 }
 0x375   :  { %v1266_v22 = vsel %vm342_vm5, %v2263_v12, %v2821_v4  ;;  %v1215_v8 = vsel %vm288_vm4, %v2248_v41, %v1207_v11 }
 0x376   :  { %v2003_v14 = vpack.c.bf16 %v1319_v19, %v1266_v22  ;;  %1990 = vmatpush1.bf16.msra.mxu0 %v1989_v13  ;;  %v1371_v13 = vsel %vm450_vm7, %v1358_v16, %v1360_v36  ;;  %v2015_v19 = vpack.c.bf16 %v1215_v8, %v2679_v2  ;;  %v1096_v2 = vsel %vm166_vm2, %v2282_v9, %v2283_v20 }
 0x378   :  { %v2271_v28 = vpop.permute.xlu1 %2270  ;;  %2004 = vmatprep.subr.bf16.mxu1 %v2003_v14  ;;  %v2296_v22 = vpop.permute.xlu0 %2295 }
 0x379   :  { %2006 = vmatpush1.bf16.msra.mxu1 %v2005_v37  ;;  %v2272_v30 = vunpack.i.l.bf16 %v2271_v28  ;;  %v2273_v63 = vunpack.i.h.bf16 %v2271_v28  ;;  %v2297_v37 = vunpack.i.l.bf16 %v2296_v22 }
 0x37b   :  { %v989_v43 = vsel %vm58_vm0, %v2198_v31, %v2272_v30  ;;  %v990_v18 = vsel %vm58_vm0, %v2272_v30, %v2273_v63  ;;  %v1320_v33 = vsel %vm396_vm6, %v2791_v27, %v2297_v37 }
 0x37c   :  { %v1356_v34 = vpop.permute.xlu1 %1355  ;;  %v2007_v44 = vpack.c.bf16 %v1042_v6, %v989_v43  ;;  %v2024_v32 = vpack.c.bf16 %v1043_v40, %v990_v18  ;;  %v1262_v25 = vpop.permute.xlu0 %1261 }
 0x37d   :  { %v1370_v23 = vsel %vm450_vm7, %v1356_v34, %v1358_v16  ;;  %v2298_v16 = vunpack.i.h.bf16 %v2296_v22 }
 0x37e   :  { %1481 = vmatprep.subr.mxu0 %v1370_v23 }
 0x380   :  { %v1354_v50 = vpop.permute.xlu1 %1353 }
 0x381   :  { %v1369_v55 = vsel %vm450_vm7, %v1354_v50, %v1356_v34 }
 0x382   :  { %1482 = vmatpush1.msra.mxu0 %v1369_v55 }
 0x383   :  { %1847 = vmatmul.mubr.msk.f32.vlgmr.msra.gmra.mrb[4].mxu0 %vm542_vm8, %v2841_v47  ;;  %2008 = vmatprep.subr.bf16.mxu0 %v2007_v44  ;;  %v1364_v44 = vpop.permute.xlu0 %1363 }
 0x384   :  { %v2286_v48 = vpop.permute.xlu1 %2285  ;;  %2010 = vmatpush1.bf16.msra.mxu0 %v2009_v56  ;;  %1671 = vmatprep.mubr.f32.mxu0 %v2310_v15 }
 0x385   :  { %v2287_v62 = vunpack.i.l.bf16 %v2286_v48  ;;  %v2288_v24 = vunpack.i.h.bf16 %v2286_v48 }
 0x387   :  { %v1148_v12 = vsel %vm220_vm3, %v2233_v5, %v2287_v62  ;;  %v1149_v26 = vsel %vm220_vm3, %v2287_v62, %v2288_v24 }
 0x388   :  { %v1362_v52 = vpop.permute.xlu1 %1361  ;;  %v2011_v46 = vpack.c.bf16 %v1148_v12, %v1095_v10  ;;  %v2027_v28 = vpack.c.bf16 %v1149_v26, %v1096_v2 }
 0x389   :  { %v1372_v38 = vsel %vm450_vm7, %v1360_v36, %v1362_v52  ;;  %v1321_v36 = vsel %vm396_vm6, %v2297_v37, %v2298_v16  ;;  %v1373_v5 = vsel %vm450_vm7, %v1362_v52, %v1364_v44 }
 0x38a   :  { %1552 = vmatprep.subr.mxu1 %v1372_v38  ;;  %2012 = vmatprep.subr.bf16.mxu0 %v2011_v46 }
 0x38b   :  { %1553 = vmatpush1.msra.mxu1 %v1371_v13  ;;  %2014 = vmatpush1.bf16.msra.mxu0 %v2013_v17 }
 0x38c   :  { %v1209_v14 = vpop.permute.xlu1 %1208  ;;  %1848 = vmatmul.mubr.msk.f32.vlgmr.msra.gmra.mrb[4].mxu1 %vm542_vm8, %v2841_v47  ;;  %2016 = vmatprep.subr.bf16.mxu0 %v2015_v19 }
 0x38d   :  { %2023 = vmatprep.subr.bf16.mxu1 %v2313_v53  ;;  %1912 = vmatprep.mubr.msk.f32.mxu1 %vm2314_vm9, %v2310_v15  ;;  %v1216_v59 = vsel %vm288_vm4, %v1207_v11, %v1209_v14 }
 0x38e   :  { %2025 = vmatpush3.bf16.msra.mxu1 %v2024_v32  ;;  %v2030_v43 = vpack.c.bf16 %v1216_v59, %v2697_v51  ;;  %v1368_v51 = vpop.permute.xlu0 %1367 }
 0x38f   :  { %2018 = vmatpush1.bf16.msra.mxu0 %v2017_v39  ;;  %2026 = vmatprep.subr.bf16.mxu1 %v2313_v53 }
 0x390   :  { %v2291_v30 = vpop.permute.xlu1 %2290 }
 0x391   :  { %v2293_v21 = vunpack.i.h.bf16 %v2291_v30  ;;  %v2292_v31 = vunpack.i.l.bf16 %v2291_v30 }
 0x392   :  { %2028 = vmatpush3.bf16.msra.mxu1 %v2027_v28 }
 0x393   :  { %v1267_v34 = vsel %vm342_vm5, %v2821_v4, %v2292_v31  ;;  %2029 = vmatprep.subr.bf16.mxu1 %v2313_v53  ;;  %v1268_v23 = vsel %vm342_vm5, %v2292_v31, %v2293_v21  ;;  %v1269_v49 = vsel %vm342_vm5, %v2293_v21, %v1262_v25 }
 0x394   :  { %v2021_v3 = vpack.c.bf16 %v1320_v33, %v1267_v34  ;;  %v1315_v50 = vpop.permute.xlu1 %1314  ;;  %v2019_v6 = vpack.c.bf16 %v1321_v36, %v1268_v23 }
 0x395   :  { %v1322_v55 = vsel %vm396_vm6, %v2298_v16, %v1315_v50 }
 0x396   :  { %v2033_v27 = vpack.c.bf16 %v1322_v55, %v1269_v49  ;;  %2031 = vmatpush3.bf16.msra.mxu1 %v2030_v43  ;;  %2020 = vmatprep.subr.bf16.mxu0 %v2019_v6 }
 0x397   :  { %2022 = vmatpush1.bf16.msra.mxu0 %v2021_v3  ;;  %2032 = vmatprep.subr.bf16.mxu1 %v2313_v53 }
 0x398   :  { %v1366_v4 = vpop.permute.xlu1 %1365 }
 0x399   :  { %v1374_v56 = vsel %vm450_vm7, %v1364_v44, %v1366_v4  ;;  %v1375_v9 = vsel %vm450_vm7, %v1366_v4, %v1368_v51 }
 0x39a   :  { %2034 = vmatpush3.bf16.msra.mxu1 %v2033_v27  ;;  %1623 = vmatprep.subr.mxu0 %v1374_v56 }
 0x39b   :  { %1624 = vmatpush1.msra.mxu0 %v1373_v5  ;;  %1910 = vmatprep.subr.mxu1 %v2310_v15 }
 0x39c   :  { %1849 = vmatmul.mubr.msk.f32.vlgmr.msra.gmra.mrb[6].mxu0 %vm542_vm8, %v2841_v47 }
 0x39e   :  { %1911 = vmatpush3.msra.mxu1 %v1375_v9 }
 0x39f   :  { %1913 = vmatmul.mubr.msk.f32.vlgmr.msra.gmra.mrb[6].mxu1 %vm542_vm8, %v2841_v47 }
 0x3a9   :  { %v1460_v11 = vpop.permute.xlu1 %1459 }
 0x456   :  { %v1531_v53 = vpop.f32.mrb[4].mxu0 }
 0x457   :  { %v1533_v58 = vpop.f32.mrb[5].mxu0  ;;  %v1532_v41 = vadd.f32 %v1531_v53, %v1460_v11  ;;  %v1851_v53 = vld [vmem:[%s2948_s3 + $0x8] sm:$0xff] }
 0x458   :  { %v1534_v63 = vadd.f32 %v1533_v58, %v1460_v11 }
 0x459   :  { %v1748_v7 = vmax.f32 %v1532_v41, 0.0 }
 0x45a   :  { %v1749_v8 = vmax.f32 %v1534_v63, 0.0 }
 0x45b   :  { %v1755_v12 = vmul.f32 %v1748_v7, %v2595_v35 }
 0x45c   :  { %v1756_v0 = vmul.f32 %v1749_v8, %v2597_v1 }
 0x45d   :  { %v1770_v47 = vmul.f32 %v1755_v12, %v1755_v12 }
 0x45e   :  { %v1771_v17 = vmul.f32 %v1756_v0, %v1756_v0  ;;  %v1762_v18 = vadd.f32 %v1756_v0, %v1755_v12 }
 0x45f   :  { %v1602_v48 = vpop.f32.mrb[4].mxu1 }
 0x460   :  { %v1604_v62 = vpop.f32.mrb[5].mxu1  ;;  %v1603_v29 = vadd.f32 %v1602_v48, %v1460_v11  ;;  %v1777_v13 = vadd.f32 %v1771_v17, %v1770_v47  ;;  %v1852_v48 = vld [vmem:[%s2949_s4 + $0x8] sm:$0xff] }
 0x461   :  { %v1605_v10 = vadd.f32 %v1604_v62, %v1460_v11 }
 0x462   :  { %v1750_v15 = vmax.f32 %v1603_v29, 0.0 }
 0x463   :  { %v1751_v46 = vmax.f32 %v1605_v10, 0.0 }
 0x464   :  { %v1757_v52 = vmul.f32 %v1750_v15, %v2599_v42 }
 0x465   :  { %v1758_v38 = vmul.f32 %v1751_v46, %v2607_v45 }
 0x466   :  { %v1772_v24 = vmul.f32 %v1757_v52, %v1757_v52  ;;  %v1763_v19 = vadd.f32 %v1762_v18, %v1757_v52 }
 0x467   :  { %v1773_v32 = vmul.f32 %v1758_v38, %v1758_v38 }
 0x468   :  { %v1778_v26 = vadd.f32 %v1777_v13, %v1772_v24  ;;  %v1764_v28 = vadd.f32 %v1763_v19, %v1758_v38 }
 0x46a   :  { %v1779_v33 = vadd.f32 %v1778_v26, %v1773_v32 }
 0x46f   :  { %v1673_v54 = vpop.f32.mrb[6].mxu0 }
 0x470   :  { %v1674_v22 = vadd.f32 %v1673_v54, %v1460_v11  ;;  %v1675_v40 = vpop.f32.mrb[7].mxu0 }
 0x471   :  { %v1676_v20 = vadd.f32 %v1675_v40, %v1460_v11 }
 0x472   :  { %v1752_v14 = vmax.f32 %v1674_v22, 0.0  ;;  %v1744_v39 = vpop.f32.mrb[6].mxu1 }
 0x473   :  { %v1753_v2 = vmax.f32 %v1676_v20, 0.0  ;;  %v1745_v16 = vadd.f32 %v1744_v39, %v1460_v11  ;;  %v1914_v37 = vpop.f32.mrb[7].mxu1 }
 0x474   :  { %v1759_v25 = vmul.f32 %v1752_v14, %v2624_v57 }
 0x475   :  { %v1760_v30 = vmul.f32 %v1753_v2, %v2626_v60  ;;  %v1754_v59 = vmax.f32 %v1745_v16, 0.0 }
 0x476   :  { %v1765_v21 = vadd.f32 %v1764_v28, %v1759_v25  ;;  %v1774_v31 = vmul.f32 %v1759_v25, %v1759_v25 }
 0x477   :  { %v1761_v34 = vmul.f32 %v1754_v59, %v2628_v61  ;;  %v1775_v23 = vmul.f32 %v1760_v30, %v1760_v30 }
 0x478   :  { %v1766_v36 = vadd.f32 %v1765_v21, %v1760_v30  ;;  %v1780_v43 = vadd.f32 %v1779_v33, %v1774_v31 }
 0x479   :  { %v1776_v50 = vmul.f32 %v1761_v34, %v1761_v34 }
 0x47a   :  { %v1767_v3 = vadd.f32 %v1766_v36, %v1761_v34  ;;  %v1781_v6 = vadd.f32 %v1780_v43, %v1775_v23 }
 0x47c   :  { %1768 = vadd.xlane.f32.xlu0 %v1767_v3  ;;  %v1782_v49 = vadd.f32 %v1781_v6, %v1776_v50 }
 0x47e   :  { %1783 = vadd.xlane.f32.xlu1 %v1782_v49 }
 0x509   :  { %v1769_v55 = vpop.xlane.xlu0 %1768 }
 0x50a   :  { %v1785_v44 = vmul.f32 0.001953125, %v1769_v55 }
 0x50b   :  { %v1784_v27 = vpop.xlane.xlu1 %1783 }
 0x50c   :  { %v1787_v4 = vmul.f32 %v1785_v44, %v1785_v44  ;;  %v1786_v56 = vmul.f32 0.001953125, %v1784_v27 }
 0x50e   :  { %v1788_v5 = vsub.f32 %v1786_v56, %v1787_v4 }
 0x510   :  { %v1789_v51 = vmax.f32 %v1788_v5, 0.0 }
 0x512   :  { %v1790_v9 = vadd.f32 1e-05, %v1789_v51 }
 0x514   :  { %2301 = vrsqrt.f32 %v1790_v9 }
 0x51e   :  { %v2302_v58 = vpop.eup %2301 }
 0x51f   :  { %v1794_v11 = vmul.f32 %v2302_v58, %v1851_v53 }
 0x521   :  { %1801 = vperm.xlu0 %2173, %v1794_v11   ;;  %v1797_v41 = vmul.f32 %v1794_v11, %v1785_v44 }
 0x523   :  { %v1798_v63 = vsub.f32 %v1852_v48, %v1797_v41 }
 0x525   :  { %1813 = vperm.xlu1 %2172, %v1798_v63  }
 0x5a0   :  { %v1802_v62 = vpop.permute.xlu0 %1801 }
 0x5a1   :  { %v1804_v29 = vmul.f32 %v1802_v62, %v1755_v12  ;;  %v1805_v7 = vmul.f32 %v1802_v62, %v1756_v0  ;;  %v1806_v8 = vmul.f32 %v1802_v62, %v1757_v52  ;;  %v1807_v15 = vmul.f32 %v1802_v62, %v1758_v38 }
 0x5a2   :  { %v1808_v10 = vmul.f32 %v1802_v62, %v1759_v25  ;;  %v1809_v46 = vmul.f32 %v1802_v62, %v1760_v30  ;;  %v1810_v13 = vmul.f32 %v1802_v62, %v1761_v34 }
 0x5a4   :  { %v1814_v47 = vpop.permute.xlu1 %1813 }
 0x5a5   :  { %v1816_v17 = vmul.f32 %v1814_v47, %v2595_v35  ;;  %v1817_v18 = vmul.f32 %v1814_v47, %v2597_v1  ;;  %v1818_v24 = vmul.f32 %v1814_v47, %v2599_v42  ;;  %v1819_v54 = vmul.f32 %v1814_v47, %v2607_v45 }
 0x5a6   :  { %v1820_v19 = vmul.f32 %v1814_v47, %v2624_v57  ;;  %v1821_v22 = vmul.f32 %v1814_v47, %v2626_v60  ;;  %v1822_v12 = vmul.f32 %v1814_v47, %v2628_v61 }
 0x5a7   :  { %v1823_v0 = vadd.f32 %v1816_v17, %v1804_v29  ;;  %v1824_v52 = vadd.f32 %v1817_v18, %v1805_v7  ;;  %v1825_v38 = vadd.f32 %v1818_v24, %v1806_v8  ;;  %v1826_v40 = vadd.f32 %v1819_v54, %v1807_v15 }
 0x5a8   :  { %v1827_v20 = vadd.f32 %v1820_v19, %v1808_v10  ;;  %v1828_v32 = vadd.f32 %v1821_v22, %v1809_v46  ;;  %v1829_v35 = vadd.f32 %v1822_v12, %v1810_v13 }
 0x5a9   :  { %1830 = vst [vmem:[%s2950_s6] sm:$0xff] %v1823_v0  ;;  %1831 = vst [vmem:[%s2950_s6 + $0x8] sm:$0xff] %v1824_v52 }
 0x5aa   :  { %1832 = vst [vmem:[%s2950_s6 + $0x10] sm:$0xff] %v1825_v38  ;;  %1833 = vst [vmem:[%s2950_s6 + $0x18] sm:$0xff] %v1826_v40 }
 0x5ab   :  { %1834 = vst [vmem:[%s2950_s6 + $0x20] sm:$0xff] %v1827_v20  ;;  %1835 = vst [vmem:[%s2950_s6 + $0x28] sm:$0xff] %v1828_v32 }
 0x5ac   :  { %1836 = vst [vmem:[%s2950_s6 + $0x30] sm:$0xff] %v1829_v35 }

</bundles_post_ra>
